<compile_context>
chip_gen: v5e
topology: v5e:2x2
jax: 0.10.0
libtpu: 0.0.40
codegen_flags: <defaults>
</compile_context>

<pallas_src>
import functools
import math

import jax
import jax.numpy as jnp
from jax.experimental import pallas as pl
from jax.experimental.pallas import tpu as pltpu  # noqa: F401 (TPU backend assumed)

# ---------------- small BERT-like config ----------------
VOCAB = 100
MAX_POS = 16
TYPE_VOCAB = 2
HIDDEN = 32
HEADS = 4
HEAD_DIM = HIDDEN // HEADS
INTERMEDIATE = 64
LAYERS = 2
LN_EPS = 1e-12
OUT_PAD = 128          # lane-dense classifier output width (col 0 = probability)

_GELU_C = 0.7978845608028654  # sqrt(2/pi)


# ---------------- in-kernel helpers ----------------
def _ln(x, g, b):
    """LayerNorm over the last axis, f32."""
    mu = jnp.mean(x, axis=-1, keepdims=True)
    var = jnp.mean(jnp.square(x - mu), axis=-1, keepdims=True)
    return (x - mu) * jax.lax.rsqrt(var + LN_EPS) * g + b


def _gelu(x):
    # TODO(synk): HF BERT uses erf-GELU; tanh approx differs at the ~1e-3 level.
    return 0.5 * x * (1.0 + jnp.tanh(_GELU_C * (x + 0.044715 * x * x * x)))


# ---------------- fully fused discriminator kernel (no grid) ----------------
def _disc_kernel(ids_ref, mask_ref,
                 wemb_ref, pemb_ref, temb_ref, emb_g_ref, emb_b_ref,
                 wqkv_ref, bqkv_ref, wo_ref, bo_ref, ln1g_ref, ln1b_ref,
                 w1_ref, b1_ref, w2_ref, b2_ref, ln2g_ref, ln2b_ref,
                 outw_ref, outb_ref,
                 out_ref, *, batch, seq):
    rows = batch * seq

    # ---- fused embedding gather: one-hot(VOCAB) @ word_emb on the MXU ----
    ids = ids_ref[...]                                               # (rows, 1) i32
    vocab_iota = jax.lax.broadcasted_iota(jnp.int32, (rows, VOCAB), 1)
    onehot = jnp.where(ids == vocab_iota, 1.0, 0.0).astype(jnp.bfloat16)
    word = jnp.dot(onehot, wemb_ref[...].astype(jnp.bfloat16),
                   preferred_element_type=jnp.float32)               # (rows, H)
    emb = (word.reshape(batch, seq, HIDDEN)
           + pemb_ref[0:seq, :][None, :, :]
           + temb_ref[0:1, :][None, :, :]).reshape(rows, HIDDEN)
    x = _ln(emb, emb_g_ref[...], emb_b_ref[...])                     # (rows, H) f32

    # ---- additive attention-mask bias, shared by all layers / heads ----
    maskf = mask_ref[...].astype(jnp.float32)                        # (B, S)
    bias = ((1.0 - maskf) * -1e9)[:, None, :]                        # (B, 1, S)
    bias = jnp.concatenate([bias] * HEADS, axis=0)                   # (HEADS*B, 1, S)

    scale = 1.0 / math.sqrt(HEAD_DIM)

    def to_heads(m):
        # (rows, H) -> (HEADS*batch, seq, HEAD_DIM), head-major along dim 0.
        return jnp.concatenate(
            [m[:, h * HEAD_DIM:(h + 1) * HEAD_DIM].reshape(batch, seq, HEAD_DIM)
             for h in range(HEADS)], axis=0)

    # ---- statically unrolled encoder layers (all weights resident in VMEM) ----
    for l in range(LAYERS):
        xb = x.astype(jnp.bfloat16)
        qkv = jnp.dot(xb, wqkv_ref[l],
                      preferred_element_type=jnp.float32) + bqkv_ref[l]   # (rows, 3H)

        # scale folded into q (tiny activation) instead of the (S,S) scores
        q_m = to_heads(qkv[:, 0:HIDDEN] * scale).astype(jnp.bfloat16)
        k_m = to_heads(qkv[:, HIDDEN:2 * HIDDEN]).astype(jnp.bfloat16)
        v_m = to_heads(qkv[:, 2 * HIDDEN:3 * HIDDEN]).astype(jnp.bfloat16)

        # one batched einsum pair over all heads (heads merged into batch dim)
        s = jnp.einsum('bqd,bkd->bqk', q_m, k_m,
                       preferred_element_type=jnp.float32) + bias         # (HB,S,S)
        s = s - jnp.max(s, axis=-1, keepdims=True)
        p = jnp.exp(s)
        p = p * pl.reciprocal(jnp.sum(p, axis=-1, keepdims=True), approx=True)
        ctx_m = jnp.einsum('bqk,bkd->bqd', p.astype(jnp.bfloat16), v_m,
                           preferred_element_type=jnp.float32)            # (HB,S,D)
        ctx = jnp.concatenate(
            [ctx_m[h * batch:(h + 1) * batch] for h in range(HEADS)],
            axis=-1).reshape(rows, HIDDEN)                                # (rows, H)

        # attention output projection + residual LayerNorm
        attn = jnp.dot(ctx.astype(jnp.bfloat16), wo_ref[l],
                       preferred_element_type=jnp.float32) + bo_ref[l]
        x = _ln(attn + x, ln1g_ref[l], ln1b_ref[l])

        # FFN (GELU) + residual LayerNorm
        h1 = _gelu(jnp.dot(x.astype(jnp.bfloat16), w1_ref[l],
                           preferred_element_type=jnp.float32) + b1_ref[l])
        h2 = jnp.dot(h1.astype(jnp.bfloat16), w2_ref[l],
                     preferred_element_type=jnp.float32) + b2_ref[l]
        x = _ln(h2 + x, ln2g_ref[l], ln2b_ref[l])

    # ---- CLS -> Linear(H, 1) -> sigmoid, lane-dense (B, OUT_PAD) output ----
    # TODO(synk): Dropout(0.3) is identity in eval/inference mode; not applied.
    cls = x.reshape(batch, seq, HIDDEN)[:, 0, :]                     # (B, H)
    logits = jnp.dot(cls.astype(jnp.bfloat16), outw_ref[...],
                     preferred_element_type=jnp.float32) + outb_ref[...]
    out_ref[...] = 1.0 / (1.0 + jnp.exp(-logits))                    # (B, OUT_PAD)


# ---------------- parameters (deterministic synthetic init) ----------------
def init_params(key):
    kw, kp, kt, kqkv, ko, k1, k2, kout = jax.random.split(key, 8)
    nrm = lambda k, s: 0.02 * jax.random.normal(k, s, dtype=jnp.float32)
    ones = lambda s: jnp.ones(s, jnp.float32)
    zeros = lambda s: jnp.zeros(s, jnp.float32)

    return {
        # embedding tables (gathered in-kernel via one-hot matmul)
        "word_emb": nrm(kw, (VOCAB, HIDDEN)),
        "pos_emb": nrm(kp, (MAX_POS, HIDDEN)),
        "type_emb": nrm(kt, (TYPE_VOCAB, HIDDEN)),
        "emb_ln_g": ones((1, HIDDEN)),
        "emb_ln_b": zeros((1, HIDDEN)),
        # stacked encoder-layer weights (leading LAYERS axis); matmul weights bf16
        "wqkv": nrm(kqkv, (LAYERS, HIDDEN, 3 * HIDDEN)).astype(jnp.bfloat16),
        "bqkv": zeros((LAYERS, 1, 3 * HIDDEN)),
        "wo": nrm(ko, (LAYERS, HIDDEN, HIDDEN)).astype(jnp.bfloat16),
        "bo": zeros((LAYERS, 1, HIDDEN)),
        "ln1_g": ones((LAYERS, 1, HIDDEN)),
        "ln1_b": zeros((LAYERS, 1, HIDDEN)),
        "w1": nrm(k1, (LAYERS, HIDDEN, INTERMEDIATE)).astype(jnp.bfloat16),
        "b1": zeros((LAYERS, 1, INTERMEDIATE)),
        "w2": nrm(k2, (LAYERS, INTERMEDIATE, HIDDEN)).astype(jnp.bfloat16),
        "b2": zeros((LAYERS, 1, HIDDEN)),
        "ln2_g": ones((LAYERS, 1, HIDDEN)),
        "ln2_b": zeros((LAYERS, 1, HIDDEN)),
        # classifier, zero-padded to a lane-dense 128-wide output slab
        "out_w": jnp.zeros((HIDDEN, OUT_PAD), jnp.float32)
                    .at[:, 0].set(nrm(kout, (HIDDEN,))).astype(jnp.bfloat16),
        "out_b": zeros((1, OUT_PAD)),
    }


# ---------------- forward pass ----------------
def discriminator_forward(params, input_ids, attention_mask):
    B, S = input_ids.shape
    ids2d = input_ids.reshape(B * S, 1).astype(jnp.int32)   # metadata-only reshape

    # Single fused kernel call: no grid, every operand resident in VMEM
    # (single-buffered), the two encoder layers statically unrolled inside.
    # TODO(synk): at real bert-base scale, reintroduce a per-layer streaming grid
    # with explicit vmem_limit_bytes, and add a leading "parallel" row-tile grid
    # axis so v7x's second TensorCore is used.
    out = pl.pallas_call(
        functools.partial(_disc_kernel, batch=B, seq=S),
        out_shape=jax.ShapeDtypeStruct((B, OUT_PAD), jnp.float32),
    )(ids2d, attention_mask.astype(jnp.int32),
      params["word_emb"], params["pos_emb"], params["type_emb"],
      params["emb_ln_g"], params["emb_ln_b"],
      params["wqkv"], params["bqkv"], params["wo"], params["bo"],
      params["ln1_g"], params["ln1_b"],
      params["w1"], params["b1"], params["w2"], params["b2"],
      params["ln2_g"], params["ln2_b"],
      params["out_w"], params["out_b"])

    return out[:, :1]                                        # (B, 1) probabilities


if __name__ == "__main__":
    key = jax.random.PRNGKey(0)
    pkey, ikey = jax.random.split(key)
    params = init_params(pkey)

    B, S = 2, 8
    input_ids = jax.random.randint(ikey, (B, S), 0, VOCAB, dtype=jnp.int32)
    attention_mask = jnp.ones((B, S), dtype=jnp.int32)

    out = jax.jit(discriminator_forward)(params, input_ids, attention_mask)
    out = jax.block_until_ready(out)

    assert out.shape == (B, 1), out.shape
    assert bool(jnp.all((out >= 0.0) & (out <= 1.0)))
    print("KERNEL_OK")
</pallas_src>

<mosaic_0001>
module attributes {stable_mosaic.version = 11 : i64} {
  func.func @_disc_kernel(%arg0: memref<16x1xi32, #tpu.memory_space<vmem>>, %arg1: memref<2x8xi32, #tpu.memory_space<vmem>>, %arg2: memref<100x32xf32, #tpu.memory_space<vmem>>, %arg3: memref<16x32xf32, #tpu.memory_space<vmem>>, %arg4: memref<2x32xf32, #tpu.memory_space<vmem>>, %arg5: memref<1x32xf32, #tpu.memory_space<vmem>>, %arg6: memref<1x32xf32, #tpu.memory_space<vmem>>, %arg7: memref<2x32x96xbf16, #tpu.memory_space<vmem>>, %arg8: memref<2x1x96xf32, #tpu.memory_space<vmem>>, %arg9: memref<2x32x32xbf16, #tpu.memory_space<vmem>>, %arg10: memref<2x1x32xf32, #tpu.memory_space<vmem>>, %arg11: memref<2x1x32xf32, #tpu.memory_space<vmem>>, %arg12: memref<2x1x32xf32, #tpu.memory_space<vmem>>, %arg13: memref<2x32x64xbf16, #tpu.memory_space<vmem>>, %arg14: memref<2x1x64xf32, #tpu.memory_space<vmem>>, %arg15: memref<2x64x32xbf16, #tpu.memory_space<vmem>>, %arg16: memref<2x1x32xf32, #tpu.memory_space<vmem>>, %arg17: memref<2x1x32xf32, #tpu.memory_space<vmem>>, %arg18: memref<2x1x32xf32, #tpu.memory_space<vmem>>, %arg19: memref<32x128xbf16, #tpu.memory_space<vmem>>, %arg20: memref<1x128xf32, #tpu.memory_space<vmem>>, %arg21: memref<2x128xf32, #tpu.memory_space<vmem>>) attributes {dimension_semantics = [], scalar_prefetch = 0 : i64, scratch_operands = 0 : i64, tpu.core_type = #tpu.core_type<tc>} {
    %c0 = arith.constant 0 : index
    %c0_0 = arith.constant 0 : index
    %0 = vector.load %arg0[%c0, %c0_0] : memref<16x1xi32, #tpu.memory_space<vmem>>, vector<16x1xi32>
    %1 = tpu.iota {dimensions = array<i32: 1>} : vector<16x100xi32>
    %2 = vector.broadcast %0 : vector<16x1xi32> to vector<16x100xi32>
    %3 = arith.cmpi eq, %2, %1 : vector<16x100xi32>
    %cst = arith.constant 1.000000e+00 : f32
    %cst_1 = arith.constant 0.000000e+00 : f32
    %4 = vector.broadcast %cst : f32 to vector<16x100xf32>
    %5 = vector.broadcast %cst_1 : f32 to vector<16x100xf32>
    %6 = arith.select %3, %4, %5 : vector<16x100xi1>, vector<16x100xf32>
    %7 = arith.truncf %6 : vector<16x100xf32> to vector<16x100xbf16>
    %c0_2 = arith.constant 0 : index
    %c0_3 = arith.constant 0 : index
    %8 = vector.load %arg2[%c0_2, %c0_3] : memref<100x32xf32, #tpu.memory_space<vmem>>, vector<100x32xf32>
    %9 = arith.truncf %8 : vector<100x32xf32> to vector<100x32xbf16>
    %cst_4 = arith.constant dense<0.000000e+00> : vector<16x32xf32>
    %10 = tpu.matmul %7, %9, %cst_4 {dimension_numbers = #tpu.dot_dimension_numbers<[1], [0], [0], [1], [0, 0, 1, 1], [], []>} : vector<16x100xbf16>, vector<100x32xbf16>, vector<16x32xf32> -> vector<16x32xf32>
    %11 = vector.shape_cast %10 : vector<16x32xf32> to vector<2x8x32xf32>
    %c0_5 = arith.constant 0 : index
    %c0_6 = arith.constant 0 : index
    %12 = vector.load %arg3[%c0_5, %c0_6] : memref<16x32xf32, #tpu.memory_space<vmem>>, vector<8x32xf32>
    %13 = vector.shape_cast %12 : vector<8x32xf32> to vector<1x8x32xf32>
    %14 = vector.broadcast %13 : vector<1x8x32xf32> to vector<2x8x32xf32>
    %15 = arith.addf %11, %14 : vector<2x8x32xf32>
    %c0_7 = arith.constant 0 : index
    %c0_8 = arith.constant 0 : index
    %16 = vector.load %arg4[%c0_7, %c0_8] : memref<2x32xf32, #tpu.memory_space<vmem>>, vector<1x32xf32>
    %17 = vector.shape_cast %16 : vector<1x32xf32> to vector<1x1x32xf32>
    %18 = vector.broadcast %17 : vector<1x1x32xf32> to vector<2x8x32xf32>
    %19 = arith.addf %15, %18 : vector<2x8x32xf32>
    %20 = vector.shape_cast %19 : vector<2x8x32xf32> to vector<16x32xf32>
    %c0_9 = arith.constant 0 : index
    %c0_10 = arith.constant 0 : index
    %21 = vector.load %arg5[%c0_9, %c0_10] : memref<1x32xf32, #tpu.memory_space<vmem>>, vector<1x32xf32>
    %c0_11 = arith.constant 0 : index
    %c0_12 = arith.constant 0 : index
    %22 = vector.load %arg6[%c0_11, %c0_12] : memref<1x32xf32, #tpu.memory_space<vmem>>, vector<1x32xf32>
    %cst_13 = arith.constant dense<0.000000e+00> : vector<16xf32>
    %23 = vector.multi_reduction <add>, %20, %cst_13 [1] : vector<16x32xf32> to vector<16xf32>
    %24 = vector.shape_cast %23 : vector<16xf32> to vector<16x1xf32>
    %cst_14 = arith.constant 3.200000e+01 : f32
    %25 = vector.broadcast %cst_14 : f32 to vector<16x1xf32>
    %26 = arith.divf %24, %25 : vector<16x1xf32>
    %27 = vector.broadcast %26 : vector<16x1xf32> to vector<16x32xf32>
    %28 = arith.subf %20, %27 : vector<16x32xf32>
    %29 = arith.mulf %28, %28 : vector<16x32xf32>
    %cst_15 = arith.constant dense<0.000000e+00> : vector<16xf32>
    %30 = vector.multi_reduction <add>, %29, %cst_15 [1] : vector<16x32xf32> to vector<16xf32>
    %31 = vector.shape_cast %30 : vector<16xf32> to vector<16x1xf32>
    %cst_16 = arith.constant 3.200000e+01 : f32
    %32 = vector.broadcast %cst_16 : f32 to vector<16x1xf32>
    %33 = arith.divf %31, %32 : vector<16x1xf32>
    %34 = vector.broadcast %26 : vector<16x1xf32> to vector<16x32xf32>
    %35 = arith.subf %20, %34 : vector<16x32xf32>
    %cst_17 = arith.constant 9.99999996E-13 : f32
    %36 = vector.broadcast %cst_17 : f32 to vector<16x1xf32>
    %37 = arith.addf %33, %36 : vector<16x1xf32>
    %38 = math.rsqrt %37 : vector<16x1xf32>
    %39 = vector.broadcast %38 : vector<16x1xf32> to vector<16x32xf32>
    %40 = arith.mulf %35, %39 : vector<16x32xf32>
    %41 = vector.broadcast %21 : vector<1x32xf32> to vector<16x32xf32>
    %42 = arith.mulf %40, %41 : vector<16x32xf32>
    %43 = vector.broadcast %22 : vector<1x32xf32> to vector<16x32xf32>
    %44 = arith.addf %42, %43 : vector<16x32xf32>
    %c0_18 = arith.constant 0 : index
    %c0_19 = arith.constant 0 : index
    %45 = vector.load %arg1[%c0_18, %c0_19] : memref<2x8xi32, #tpu.memory_space<vmem>>, vector<2x8xi32>
    %46 = arith.sitofp %45 : vector<2x8xi32> to vector<2x8xf32>
    %cst_20 = arith.constant 1.000000e+00 : f32
    %47 = vector.broadcast %cst_20 : f32 to vector<2x8xf32>
    %48 = arith.subf %47, %46 : vector<2x8xf32>
    %cst_21 = arith.constant -1.000000e+09 : f32
    %49 = vector.broadcast %cst_21 : f32 to vector<2x8xf32>
    %50 = arith.mulf %48, %49 : vector<2x8xf32>
    %51 = vector.shape_cast %50 : vector<2x8xf32> to vector<2x1x8xf32>
    %52 = tpu.concatenate %51, %51, %51, %51 in 0 : vector<2x1x8xf32>, vector<2x1x8xf32>, vector<2x1x8xf32>, vector<2x1x8xf32> -> vector<8x1x8xf32>
    %53 = arith.truncf %44 : vector<16x32xf32> to vector<16x32xbf16>
    %c0_22 = arith.constant 0 : index
    %c0_23 = arith.constant 0 : index
    %c0_24 = arith.constant 0 : index
    %54 = vector.load %arg7[%c0_22, %c0_23, %c0_24] : memref<2x32x96xbf16, #tpu.memory_space<vmem>>, vector<1x32x96xbf16>
    %55 = vector.shape_cast %54 : vector<1x32x96xbf16> to vector<32x96xbf16>
    %cst_25 = arith.constant dense<0.000000e+00> : vector<16x96xf32>
    %56 = tpu.matmul %53, %55, %cst_25 {dimension_numbers = #tpu.dot_dimension_numbers<[1], [0], [0], [1], [0, 0, 1, 1], [], []>} : vector<16x32xbf16>, vector<32x96xbf16>, vector<16x96xf32> -> vector<16x96xf32>
    %c0_26 = arith.constant 0 : index
    %c0_27 = arith.constant 0 : index
    %c0_28 = arith.constant 0 : index
    %57 = vector.load %arg8[%c0_26, %c0_27, %c0_28] : memref<2x1x96xf32, #tpu.memory_space<vmem>>, vector<1x1x96xf32>
    %58 = vector.shape_cast %57 : vector<1x1x96xf32> to vector<1x96xf32>
    %59 = vector.broadcast %58 : vector<1x96xf32> to vector<16x96xf32>
    %60 = arith.addf %56, %59 : vector<16x96xf32>
    %61 = vector.extract_strided_slice %60 {offsets = [0, 0], sizes = [16, 32], strides = [1, 1]} : vector<16x96xf32> to vector<16x32xf32>
    %cst_29 = arith.constant 0.353553385 : f32
    %62 = vector.broadcast %cst_29 : f32 to vector<16x32xf32>
    %63 = arith.mulf %61, %62 : vector<16x32xf32>
    %64 = vector.extract_strided_slice %63 {offsets = [0, 0], sizes = [16, 8], strides = [1, 1]} : vector<16x32xf32> to vector<16x8xf32>
    %65 = vector.shape_cast %64 : vector<16x8xf32> to vector<2x8x8xf32>
    %66 = vector.extract_strided_slice %63 {offsets = [0, 8], sizes = [16, 8], strides = [1, 1]} : vector<16x32xf32> to vector<16x8xf32>
    %67 = vector.shape_cast %66 : vector<16x8xf32> to vector<2x8x8xf32>
    %68 = vector.extract_strided_slice %63 {offsets = [0, 16], sizes = [16, 8], strides = [1, 1]} : vector<16x32xf32> to vector<16x8xf32>
    %69 = vector.shape_cast %68 : vector<16x8xf32> to vector<2x8x8xf32>
    %70 = vector.extract_strided_slice %63 {offsets = [0, 24], sizes = [16, 8], strides = [1, 1]} : vector<16x32xf32> to vector<16x8xf32>
    %71 = vector.shape_cast %70 : vector<16x8xf32> to vector<2x8x8xf32>
    %72 = tpu.concatenate %65, %67, %69, %71 in 0 : vector<2x8x8xf32>, vector<2x8x8xf32>, vector<2x8x8xf32>, vector<2x8x8xf32> -> vector<8x8x8xf32>
    %73 = arith.truncf %72 : vector<8x8x8xf32> to vector<8x8x8xbf16>
    %74 = vector.extract_strided_slice %60 {offsets = [0, 32], sizes = [16, 32], strides = [1, 1]} : vector<16x96xf32> to vector<16x32xf32>
    %75 = vector.extract_strided_slice %74 {offsets = [0, 0], sizes = [16, 8], strides = [1, 1]} : vector<16x32xf32> to vector<16x8xf32>
    %76 = vector.shape_cast %75 : vector<16x8xf32> to vector<2x8x8xf32>
    %77 = vector.extract_strided_slice %74 {offsets = [0, 8], sizes = [16, 8], strides = [1, 1]} : vector<16x32xf32> to vector<16x8xf32>
    %78 = vector.shape_cast %77 : vector<16x8xf32> to vector<2x8x8xf32>
    %79 = vector.extract_strided_slice %74 {offsets = [0, 16], sizes = [16, 8], strides = [1, 1]} : vector<16x32xf32> to vector<16x8xf32>
    %80 = vector.shape_cast %79 : vector<16x8xf32> to vector<2x8x8xf32>
    %81 = vector.extract_strided_slice %74 {offsets = [0, 24], sizes = [16, 8], strides = [1, 1]} : vector<16x32xf32> to vector<16x8xf32>
    %82 = vector.shape_cast %81 : vector<16x8xf32> to vector<2x8x8xf32>
    %83 = tpu.concatenate %76, %78, %80, %82 in 0 : vector<2x8x8xf32>, vector<2x8x8xf32>, vector<2x8x8xf32>, vector<2x8x8xf32> -> vector<8x8x8xf32>
    %84 = arith.truncf %83 : vector<8x8x8xf32> to vector<8x8x8xbf16>
    %85 = vector.extract_strided_slice %60 {offsets = [0, 64], sizes = [16, 32], strides = [1, 1]} : vector<16x96xf32> to vector<16x32xf32>
    %86 = vector.extract_strided_slice %85 {offsets = [0, 0], sizes = [16, 8], strides = [1, 1]} : vector<16x32xf32> to vector<16x8xf32>
    %87 = vector.shape_cast %86 : vector<16x8xf32> to vector<2x8x8xf32>
    %88 = vector.extract_strided_slice %85 {offsets = [0, 8], sizes = [16, 8], strides = [1, 1]} : vector<16x32xf32> to vector<16x8xf32>
    %89 = vector.shape_cast %88 : vector<16x8xf32> to vector<2x8x8xf32>
    %90 = vector.extract_strided_slice %85 {offsets = [0, 16], sizes = [16, 8], strides = [1, 1]} : vector<16x32xf32> to vector<16x8xf32>
    %91 = vector.shape_cast %90 : vector<16x8xf32> to vector<2x8x8xf32>
    %92 = vector.extract_strided_slice %85 {offsets = [0, 24], sizes = [16, 8], strides = [1, 1]} : vector<16x32xf32> to vector<16x8xf32>
    %93 = vector.shape_cast %92 : vector<16x8xf32> to vector<2x8x8xf32>
    %94 = tpu.concatenate %87, %89, %91, %93 in 0 : vector<2x8x8xf32>, vector<2x8x8xf32>, vector<2x8x8xf32>, vector<2x8x8xf32> -> vector<8x8x8xf32>
    %95 = arith.truncf %94 : vector<8x8x8xf32> to vector<8x8x8xbf16>
    "tpu.trace_start"() <{level = 10 : i32, message = "bqd,bkd->bqk"}> : () -> ()
    %cst_30 = arith.constant dense<0.000000e+00> : vector<8x8x8xf32>
    %96 = tpu.matmul %73, %84, %cst_30 {dimension_numbers = #tpu.dot_dimension_numbers<[2], [2], [1], [1], [0, 0, 0, 1, 1, 1], [0], [0]>} : vector<8x8x8xbf16>, vector<8x8x8xbf16>, vector<8x8x8xf32> -> vector<8x8x8xf32>
    "tpu.trace_stop"() : () -> ()
    %97 = vector.broadcast %52 : vector<8x1x8xf32> to vector<8x8x8xf32>
    %98 = arith.addf %96, %97 : vector<8x8x8xf32>
    %cst_31 = arith.constant dense<0xFF800000> : vector<8x8xf32>
    %99 = vector.multi_reduction <maximumf>, %98, %cst_31 [2] : vector<8x8x8xf32> to vector<8x8xf32>
    %100 = vector.shape_cast %99 : vector<8x8xf32> to vector<8x8x1xf32>
    %101 = vector.broadcast %100 : vector<8x8x1xf32> to vector<8x8x8xf32>
    %102 = arith.subf %98, %101 : vector<8x8x8xf32>
    %103 = math.exp %102 : vector<8x8x8xf32>
    %cst_32 = arith.constant dense<0.000000e+00> : vector<8x8xf32>
    %104 = vector.multi_reduction <add>, %103, %cst_32 [2] : vector<8x8x8xf32> to vector<8x8xf32>
    %105 = vector.shape_cast %104 : vector<8x8xf32> to vector<8x8x1xf32>
    %106 = tpu.reciprocal %105 {approx = true} : vector<8x8x1xf32> -> vector<8x8x1xf32>
    %107 = vector.broadcast %106 : vector<8x8x1xf32> to vector<8x8x8xf32>
    %108 = arith.mulf %103, %107 : vector<8x8x8xf32>
    %109 = arith.truncf %108 : vector<8x8x8xf32> to vector<8x8x8xbf16>
    "tpu.trace_start"() <{level = 10 : i32, message = "bqk,bkd->bqd"}> : () -> ()
    %cst_33 = arith.constant dense<0.000000e+00> : vector<8x8x8xf32>
    %110 = tpu.matmul %109, %95, %cst_33 {dimension_numbers = #tpu.dot_dimension_numbers<[2], [1], [1], [2], [0, 0, 0, 1, 1, 2], [0], [0]>} : vector<8x8x8xbf16>, vector<8x8x8xbf16>, vector<8x8x8xf32> -> vector<8x8x8xf32>
    "tpu.trace_stop"() : () -> ()
    %111 = vector.extract_strided_slice %110 {offsets = [0, 0, 0], sizes = [2, 8, 8], strides = [1, 1, 1]} : vector<8x8x8xf32> to vector<2x8x8xf32>
    %112 = vector.extract_strided_slice %110 {offsets = [2, 0, 0], sizes = [2, 8, 8], strides = [1, 1, 1]} : vector<8x8x8xf32> to vector<2x8x8xf32>
    %113 = vector.extract_strided_slice %110 {offsets = [4, 0, 0], sizes = [2, 8, 8], strides = [1, 1, 1]} : vector<8x8x8xf32> to vector<2x8x8xf32>
    %114 = vector.extract_strided_slice %110 {offsets = [6, 0, 0], sizes = [2, 8, 8], strides = [1, 1, 1]} : vector<8x8x8xf32> to vector<2x8x8xf32>
    %115 = tpu.concatenate %111, %112, %113, %114 in 2 : vector<2x8x8xf32>, vector<2x8x8xf32>, vector<2x8x8xf32>, vector<2x8x8xf32> -> vector<2x8x32xf32>
    %116 = vector.shape_cast %115 : vector<2x8x32xf32> to vector<16x32xf32>
    %117 = arith.truncf %116 : vector<16x32xf32> to vector<16x32xbf16>
    %c0_34 = arith.constant 0 : index
    %c0_35 = arith.constant 0 : index
    %c0_36 = arith.constant 0 : index
    %118 = vector.load %arg9[%c0_34, %c0_35, %c0_36] : memref<2x32x32xbf16, #tpu.memory_space<vmem>>, vector<1x32x32xbf16>
    %119 = vector.shape_cast %118 : vector<1x32x32xbf16> to vector<32x32xbf16>
    %cst_37 = arith.constant dense<0.000000e+00> : vector<16x32xf32>
    %120 = tpu.matmul %117, %119, %cst_37 {dimension_numbers = #tpu.dot_dimension_numbers<[1], [0], [0], [1], [0, 0, 1, 1], [], []>} : vector<16x32xbf16>, vector<32x32xbf16>, vector<16x32xf32> -> vector<16x32xf32>
    %c0_38 = arith.constant 0 : index
    %c0_39 = arith.constant 0 : index
    %c0_40 = arith.constant 0 : index
    %121 = vector.load %arg10[%c0_38, %c0_39, %c0_40] : memref<2x1x32xf32, #tpu.memory_space<vmem>>, vector<1x1x32xf32>
    %122 = vector.shape_cast %121 : vector<1x1x32xf32> to vector<1x32xf32>
    %123 = vector.broadcast %122 : vector<1x32xf32> to vector<16x32xf32>
    %124 = arith.addf %120, %123 : vector<16x32xf32>
    %125 = arith.addf %124, %44 : vector<16x32xf32>
    %c0_41 = arith.constant 0 : index
    %c0_42 = arith.constant 0 : index
    %c0_43 = arith.constant 0 : index
    %126 = vector.load %arg11[%c0_41, %c0_42, %c0_43] : memref<2x1x32xf32, #tpu.memory_space<vmem>>, vector<1x1x32xf32>
    %127 = vector.shape_cast %126 : vector<1x1x32xf32> to vector<1x32xf32>
    %c0_44 = arith.constant 0 : index
    %c0_45 = arith.constant 0 : index
    %c0_46 = arith.constant 0 : index
    %128 = vector.load %arg12[%c0_44, %c0_45, %c0_46] : memref<2x1x32xf32, #tpu.memory_space<vmem>>, vector<1x1x32xf32>
    %129 = vector.shape_cast %128 : vector<1x1x32xf32> to vector<1x32xf32>
    %cst_47 = arith.constant dense<0.000000e+00> : vector<16xf32>
    %130 = vector.multi_reduction <add>, %125, %cst_47 [1] : vector<16x32xf32> to vector<16xf32>
    %131 = vector.shape_cast %130 : vector<16xf32> to vector<16x1xf32>
    %cst_48 = arith.constant 3.200000e+01 : f32
    %132 = vector.broadcast %cst_48 : f32 to vector<16x1xf32>
    %133 = arith.divf %131, %132 : vector<16x1xf32>
    %134 = vector.broadcast %133 : vector<16x1xf32> to vector<16x32xf32>
    %135 = arith.subf %125, %134 : vector<16x32xf32>
    %136 = arith.mulf %135, %135 : vector<16x32xf32>
    %cst_49 = arith.constant dense<0.000000e+00> : vector<16xf32>
    %137 = vector.multi_reduction <add>, %136, %cst_49 [1] : vector<16x32xf32> to vector<16xf32>
    %138 = vector.shape_cast %137 : vector<16xf32> to vector<16x1xf32>
    %cst_50 = arith.constant 3.200000e+01 : f32
    %139 = vector.broadcast %cst_50 : f32 to vector<16x1xf32>
    %140 = arith.divf %138, %139 : vector<16x1xf32>
    %141 = vector.broadcast %133 : vector<16x1xf32> to vector<16x32xf32>
    %142 = arith.subf %125, %141 : vector<16x32xf32>
    %cst_51 = arith.constant 9.99999996E-13 : f32
    %143 = vector.broadcast %cst_51 : f32 to vector<16x1xf32>
    %144 = arith.addf %140, %143 : vector<16x1xf32>
    %145 = math.rsqrt %144 : vector<16x1xf32>
    %146 = vector.broadcast %145 : vector<16x1xf32> to vector<16x32xf32>
    %147 = arith.mulf %142, %146 : vector<16x32xf32>
    %148 = vector.broadcast %127 : vector<1x32xf32> to vector<16x32xf32>
    %149 = arith.mulf %147, %148 : vector<16x32xf32>
    %150 = vector.broadcast %129 : vector<1x32xf32> to vector<16x32xf32>
    %151 = arith.addf %149, %150 : vector<16x32xf32>
    %152 = arith.truncf %151 : vector<16x32xf32> to vector<16x32xbf16>
    %c0_52 = arith.constant 0 : index
    %c0_53 = arith.constant 0 : index
    %c0_54 = arith.constant 0 : index
    %153 = vector.load %arg13[%c0_52, %c0_53, %c0_54] : memref<2x32x64xbf16, #tpu.memory_space<vmem>>, vector<1x32x64xbf16>
    %154 = vector.shape_cast %153 : vector<1x32x64xbf16> to vector<32x64xbf16>
    %cst_55 = arith.constant dense<0.000000e+00> : vector<16x64xf32>
    %155 = tpu.matmul %152, %154, %cst_55 {dimension_numbers = #tpu.dot_dimension_numbers<[1], [0], [0], [1], [0, 0, 1, 1], [], []>} : vector<16x32xbf16>, vector<32x64xbf16>, vector<16x64xf32> -> vector<16x64xf32>
    %c0_56 = arith.constant 0 : index
    %c0_57 = arith.constant 0 : index
    %c0_58 = arith.constant 0 : index
    %156 = vector.load %arg14[%c0_56, %c0_57, %c0_58] : memref<2x1x64xf32, #tpu.memory_space<vmem>>, vector<1x1x64xf32>
    %157 = vector.shape_cast %156 : vector<1x1x64xf32> to vector<1x64xf32>
    %158 = vector.broadcast %157 : vector<1x64xf32> to vector<16x64xf32>
    %159 = arith.addf %155, %158 : vector<16x64xf32>
    %cst_59 = arith.constant 5.000000e-01 : f32
    %160 = vector.broadcast %cst_59 : f32 to vector<16x64xf32>
    %161 = arith.mulf %160, %159 : vector<16x64xf32>
    %cst_60 = arith.constant 4.471500e-02 : f32
    %162 = vector.broadcast %cst_60 : f32 to vector<16x64xf32>
    %163 = arith.mulf %162, %159 : vector<16x64xf32>
    %164 = arith.mulf %163, %159 : vector<16x64xf32>
    %165 = arith.mulf %164, %159 : vector<16x64xf32>
    %166 = arith.addf %159, %165 : vector<16x64xf32>
    %cst_61 = arith.constant 0.797884583 : f32
    %167 = vector.broadcast %cst_61 : f32 to vector<16x64xf32>
    %168 = arith.mulf %167, %166 : vector<16x64xf32>
    %169 = math.tanh %168 : vector<16x64xf32>
    %cst_62 = arith.constant 1.000000e+00 : f32
    %170 = vector.broadcast %cst_62 : f32 to vector<16x64xf32>
    %171 = arith.addf %170, %169 : vector<16x64xf32>
    %172 = arith.mulf %161, %171 : vector<16x64xf32>
    %173 = arith.truncf %172 : vector<16x64xf32> to vector<16x64xbf16>
    %c0_63 = arith.constant 0 : index
    %c0_64 = arith.constant 0 : index
    %c0_65 = arith.constant 0 : index
    %174 = vector.load %arg15[%c0_63, %c0_64, %c0_65] : memref<2x64x32xbf16, #tpu.memory_space<vmem>>, vector<1x64x32xbf16>
    %175 = vector.shape_cast %174 : vector<1x64x32xbf16> to vector<64x32xbf16>
    %cst_66 = arith.constant dense<0.000000e+00> : vector<16x32xf32>
    %176 = tpu.matmul %173, %175, %cst_66 {dimension_numbers = #tpu.dot_dimension_numbers<[1], [0], [0], [1], [0, 0, 1, 1], [], []>} : vector<16x64xbf16>, vector<64x32xbf16>, vector<16x32xf32> -> vector<16x32xf32>
    %c0_67 = arith.constant 0 : index
    %c0_68 = arith.constant 0 : index
    %c0_69 = arith.constant 0 : index
    %177 = vector.load %arg16[%c0_67, %c0_68, %c0_69] : memref<2x1x32xf32, #tpu.memory_space<vmem>>, vector<1x1x32xf32>
    %178 = vector.shape_cast %177 : vector<1x1x32xf32> to vector<1x32xf32>
    %179 = vector.broadcast %178 : vector<1x32xf32> to vector<16x32xf32>
    %180 = arith.addf %176, %179 : vector<16x32xf32>
    %181 = arith.addf %180, %151 : vector<16x32xf32>
    %c0_70 = arith.constant 0 : index
    %c0_71 = arith.constant 0 : index
    %c0_72 = arith.constant 0 : index
    %182 = vector.load %arg17[%c0_70, %c0_71, %c0_72] : memref<2x1x32xf32, #tpu.memory_space<vmem>>, vector<1x1x32xf32>
    %183 = vector.shape_cast %182 : vector<1x1x32xf32> to vector<1x32xf32>
    %c0_73 = arith.constant 0 : index
    %c0_74 = arith.constant 0 : index
    %c0_75 = arith.constant 0 : index
    %184 = vector.load %arg18[%c0_73, %c0_74, %c0_75] : memref<2x1x32xf32, #tpu.memory_space<vmem>>, vector<1x1x32xf32>
    %185 = vector.shape_cast %184 : vector<1x1x32xf32> to vector<1x32xf32>
    %cst_76 = arith.constant dense<0.000000e+00> : vector<16xf32>
    %186 = vector.multi_reduction <add>, %181, %cst_76 [1] : vector<16x32xf32> to vector<16xf32>
    %187 = vector.shape_cast %186 : vector<16xf32> to vector<16x1xf32>
    %cst_77 = arith.constant 3.200000e+01 : f32
    %188 = vector.broadcast %cst_77 : f32 to vector<16x1xf32>
    %189 = arith.divf %187, %188 : vector<16x1xf32>
    %190 = vector.broadcast %189 : vector<16x1xf32> to vector<16x32xf32>
    %191 = arith.subf %181, %190 : vector<16x32xf32>
    %192 = arith.mulf %191, %191 : vector<16x32xf32>
    %cst_78 = arith.constant dense<0.000000e+00> : vector<16xf32>
    %193 = vector.multi_reduction <add>, %192, %cst_78 [1] : vector<16x32xf32> to vector<16xf32>
    %194 = vector.shape_cast %193 : vector<16xf32> to vector<16x1xf32>
    %cst_79 = arith.constant 3.200000e+01 : f32
    %195 = vector.broadcast %cst_79 : f32 to vector<16x1xf32>
    %196 = arith.divf %194, %195 : vector<16x1xf32>
    %197 = vector.broadcast %189 : vector<16x1xf32> to vector<16x32xf32>
    %198 = arith.subf %181, %197 : vector<16x32xf32>
    %cst_80 = arith.constant 9.99999996E-13 : f32
    %199 = vector.broadcast %cst_80 : f32 to vector<16x1xf32>
    %200 = arith.addf %196, %199 : vector<16x1xf32>
    %201 = math.rsqrt %200 : vector<16x1xf32>
    %202 = vector.broadcast %201 : vector<16x1xf32> to vector<16x32xf32>
    %203 = arith.mulf %198, %202 : vector<16x32xf32>
    %204 = vector.broadcast %183 : vector<1x32xf32> to vector<16x32xf32>
    %205 = arith.mulf %203, %204 : vector<16x32xf32>
    %206 = vector.broadcast %185 : vector<1x32xf32> to vector<16x32xf32>
    %207 = arith.addf %205, %206 : vector<16x32xf32>
    %208 = arith.truncf %207 : vector<16x32xf32> to vector<16x32xbf16>
    %c1 = arith.constant 1 : index
    %c0_81 = arith.constant 0 : index
    %c0_82 = arith.constant 0 : index
    %209 = vector.load %arg7[%c1, %c0_81, %c0_82] : memref<2x32x96xbf16, #tpu.memory_space<vmem>>, vector<1x32x96xbf16>
    %210 = vector.shape_cast %209 : vector<1x32x96xbf16> to vector<32x96xbf16>
    %cst_83 = arith.constant dense<0.000000e+00> : vector<16x96xf32>
    %211 = tpu.matmul %208, %210, %cst_83 {dimension_numbers = #tpu.dot_dimension_numbers<[1], [0], [0], [1], [0, 0, 1, 1], [], []>} : vector<16x32xbf16>, vector<32x96xbf16>, vector<16x96xf32> -> vector<16x96xf32>
    %c1_84 = arith.constant 1 : index
    %c0_85 = arith.constant 0 : index
    %c0_86 = arith.constant 0 : index
    %212 = vector.load %arg8[%c1_84, %c0_85, %c0_86] : memref<2x1x96xf32, #tpu.memory_space<vmem>>, vector<1x1x96xf32>
    %213 = vector.shape_cast %212 : vector<1x1x96xf32> to vector<1x96xf32>
    %214 = vector.broadcast %213 : vector<1x96xf32> to vector<16x96xf32>
    %215 = arith.addf %211, %214 : vector<16x96xf32>
    %216 = vector.extract_strided_slice %215 {offsets = [0, 0], sizes = [16, 32], strides = [1, 1]} : vector<16x96xf32> to vector<16x32xf32>
    %cst_87 = arith.constant 0.353553385 : f32
    %217 = vector.broadcast %cst_87 : f32 to vector<16x32xf32>
    %218 = arith.mulf %216, %217 : vector<16x32xf32>
    %219 = vector.extract_strided_slice %218 {offsets = [0, 0], sizes = [16, 8], strides = [1, 1]} : vector<16x32xf32> to vector<16x8xf32>
    %220 = vector.shape_cast %219 : vector<16x8xf32> to vector<2x8x8xf32>
    %221 = vector.extract_strided_slice %218 {offsets = [0, 8], sizes = [16, 8], strides = [1, 1]} : vector<16x32xf32> to vector<16x8xf32>
    %222 = vector.shape_cast %221 : vector<16x8xf32> to vector<2x8x8xf32>
    %223 = vector.extract_strided_slice %218 {offsets = [0, 16], sizes = [16, 8], strides = [1, 1]} : vector<16x32xf32> to vector<16x8xf32>
    %224 = vector.shape_cast %223 : vector<16x8xf32> to vector<2x8x8xf32>
    %225 = vector.extract_strided_slice %218 {offsets = [0, 24], sizes = [16, 8], strides = [1, 1]} : vector<16x32xf32> to vector<16x8xf32>
    %226 = vector.shape_cast %225 : vector<16x8xf32> to vector<2x8x8xf32>
    %227 = tpu.concatenate %220, %222, %224, %226 in 0 : vector<2x8x8xf32>, vector<2x8x8xf32>, vector<2x8x8xf32>, vector<2x8x8xf32> -> vector<8x8x8xf32>
    %228 = arith.truncf %227 : vector<8x8x8xf32> to vector<8x8x8xbf16>
    %229 = vector.extract_strided_slice %215 {offsets = [0, 32], sizes = [16, 32], strides = [1, 1]} : vector<16x96xf32> to vector<16x32xf32>
    %230 = vector.extract_strided_slice %229 {offsets = [0, 0], sizes = [16, 8], strides = [1, 1]} : vector<16x32xf32> to vector<16x8xf32>
    %231 = vector.shape_cast %230 : vector<16x8xf32> to vector<2x8x8xf32>
    %232 = vector.extract_strided_slice %229 {offsets = [0, 8], sizes = [16, 8], strides = [1, 1]} : vector<16x32xf32> to vector<16x8xf32>
    %233 = vector.shape_cast %232 : vector<16x8xf32> to vector<2x8x8xf32>
    %234 = vector.extract_strided_slice %229 {offsets = [0, 16], sizes = [16, 8], strides = [1, 1]} : vector<16x32xf32> to vector<16x8xf32>
    %235 = vector.shape_cast %234 : vector<16x8xf32> to vector<2x8x8xf32>
    %236 = vector.extract_strided_slice %229 {offsets = [0, 24], sizes = [16, 8], strides = [1, 1]} : vector<16x32xf32> to vector<16x8xf32>
    %237 = vector.shape_cast %236 : vector<16x8xf32> to vector<2x8x8xf32>
    %238 = tpu.concatenate %231, %233, %235, %237 in 0 : vector<2x8x8xf32>, vector<2x8x8xf32>, vector<2x8x8xf32>, vector<2x8x8xf32> -> vector<8x8x8xf32>
    %239 = arith.truncf %238 : vector<8x8x8xf32> to vector<8x8x8xbf16>
    %240 = vector.extract_strided_slice %215 {offsets = [0, 64], sizes = [16, 32], strides = [1, 1]} : vector<16x96xf32> to vector<16x32xf32>
    %241 = vector.extract_strided_slice %240 {offsets = [0, 0], sizes = [16, 8], strides = [1, 1]} : vector<16x32xf32> to vector<16x8xf32>
    %242 = vector.shape_cast %241 : vector<16x8xf32> to vector<2x8x8xf32>
    %243 = vector.extract_strided_slice %240 {offsets = [0, 8], sizes = [16, 8], strides = [1, 1]} : vector<16x32xf32> to vector<16x8xf32>
    %244 = vector.shape_cast %243 : vector<16x8xf32> to vector<2x8x8xf32>
    %245 = vector.extract_strided_slice %240 {offsets = [0, 16], sizes = [16, 8], strides = [1, 1]} : vector<16x32xf32> to vector<16x8xf32>
    %246 = vector.shape_cast %245 : vector<16x8xf32> to vector<2x8x8xf32>
    %247 = vector.extract_strided_slice %240 {offsets = [0, 24], sizes = [16, 8], strides = [1, 1]} : vector<16x32xf32> to vector<16x8xf32>
    %248 = vector.shape_cast %247 : vector<16x8xf32> to vector<2x8x8xf32>
    %249 = tpu.concatenate %242, %244, %246, %248 in 0 : vector<2x8x8xf32>, vector<2x8x8xf32>, vector<2x8x8xf32>, vector<2x8x8xf32> -> vector<8x8x8xf32>
    %250 = arith.truncf %249 : vector<8x8x8xf32> to vector<8x8x8xbf16>
    "tpu.trace_start"() <{level = 10 : i32, message = "bqd,bkd->bqk"}> : () -> ()
    %cst_88 = arith.constant dense<0.000000e+00> : vector<8x8x8xf32>
    %251 = tpu.matmul %228, %239, %cst_88 {dimension_numbers = #tpu.dot_dimension_numbers<[2], [2], [1], [1], [0, 0, 0, 1, 1, 1], [0], [0]>} : vector<8x8x8xbf16>, vector<8x8x8xbf16>, vector<8x8x8xf32> -> vector<8x8x8xf32>
    "tpu.trace_stop"() : () -> ()
    %252 = vector.broadcast %52 : vector<8x1x8xf32> to vector<8x8x8xf32>
    %253 = arith.addf %251, %252 : vector<8x8x8xf32>
    %cst_89 = arith.constant dense<0xFF800000> : vector<8x8xf32>
    %254 = vector.multi_reduction <maximumf>, %253, %cst_89 [2] : vector<8x8x8xf32> to vector<8x8xf32>
    %255 = vector.shape_cast %254 : vector<8x8xf32> to vector<8x8x1xf32>
    %256 = vector.broadcast %255 : vector<8x8x1xf32> to vector<8x8x8xf32>
    %257 = arith.subf %253, %256 : vector<8x8x8xf32>
    %258 = math.exp %257 : vector<8x8x8xf32>
    %cst_90 = arith.constant dense<0.000000e+00> : vector<8x8xf32>
    %259 = vector.multi_reduction <add>, %258, %cst_90 [2] : vector<8x8x8xf32> to vector<8x8xf32>
    %260 = vector.shape_cast %259 : vector<8x8xf32> to vector<8x8x1xf32>
    %261 = tpu.reciprocal %260 {approx = true} : vector<8x8x1xf32> -> vector<8x8x1xf32>
    %262 = vector.broadcast %261 : vector<8x8x1xf32> to vector<8x8x8xf32>
    %263 = arith.mulf %258, %262 : vector<8x8x8xf32>
    %264 = arith.truncf %263 : vector<8x8x8xf32> to vector<8x8x8xbf16>
    "tpu.trace_start"() <{level = 10 : i32, message = "bqk,bkd->bqd"}> : () -> ()
    %cst_91 = arith.constant dense<0.000000e+00> : vector<8x8x8xf32>
    %265 = tpu.matmul %264, %250, %cst_91 {dimension_numbers = #tpu.dot_dimension_numbers<[2], [1], [1], [2], [0, 0, 0, 1, 1, 2], [0], [0]>} : vector<8x8x8xbf16>, vector<8x8x8xbf16>, vector<8x8x8xf32> -> vector<8x8x8xf32>
    "tpu.trace_stop"() : () -> ()
    %266 = vector.extract_strided_slice %265 {offsets = [0, 0, 0], sizes = [2, 8, 8], strides = [1, 1, 1]} : vector<8x8x8xf32> to vector<2x8x8xf32>
    %267 = vector.extract_strided_slice %265 {offsets = [2, 0, 0], sizes = [2, 8, 8], strides = [1, 1, 1]} : vector<8x8x8xf32> to vector<2x8x8xf32>
    %268 = vector.extract_strided_slice %265 {offsets = [4, 0, 0], sizes = [2, 8, 8], strides = [1, 1, 1]} : vector<8x8x8xf32> to vector<2x8x8xf32>
    %269 = vector.extract_strided_slice %265 {offsets = [6, 0, 0], sizes = [2, 8, 8], strides = [1, 1, 1]} : vector<8x8x8xf32> to vector<2x8x8xf32>
    %270 = tpu.concatenate %266, %267, %268, %269 in 2 : vector<2x8x8xf32>, vector<2x8x8xf32>, vector<2x8x8xf32>, vector<2x8x8xf32> -> vector<2x8x32xf32>
    %271 = vector.shape_cast %270 : vector<2x8x32xf32> to vector<16x32xf32>
    %272 = arith.truncf %271 : vector<16x32xf32> to vector<16x32xbf16>
    %c1_92 = arith.constant 1 : index
    %c0_93 = arith.constant 0 : index
    %c0_94 = arith.constant 0 : index
    %273 = vector.load %arg9[%c1_92, %c0_93, %c0_94] : memref<2x32x32xbf16, #tpu.memory_space<vmem>>, vector<1x32x32xbf16>
    %274 = vector.shape_cast %273 : vector<1x32x32xbf16> to vector<32x32xbf16>
    %cst_95 = arith.constant dense<0.000000e+00> : vector<16x32xf32>
    %275 = tpu.matmul %272, %274, %cst_95 {dimension_numbers = #tpu.dot_dimension_numbers<[1], [0], [0], [1], [0, 0, 1, 1], [], []>} : vector<16x32xbf16>, vector<32x32xbf16>, vector<16x32xf32> -> vector<16x32xf32>
    %c1_96 = arith.constant 1 : index
    %c0_97 = arith.constant 0 : index
    %c0_98 = arith.constant 0 : index
    %276 = vector.load %arg10[%c1_96, %c0_97, %c0_98] : memref<2x1x32xf32, #tpu.memory_space<vmem>>, vector<1x1x32xf32>
    %277 = vector.shape_cast %276 : vector<1x1x32xf32> to vector<1x32xf32>
    %278 = vector.broadcast %277 : vector<1x32xf32> to vector<16x32xf32>
    %279 = arith.addf %275, %278 : vector<16x32xf32>
    %280 = arith.addf %279, %207 : vector<16x32xf32>
    %c1_99 = arith.constant 1 : index
    %c0_100 = arith.constant 0 : index
    %c0_101 = arith.constant 0 : index
    %281 = vector.load %arg11[%c1_99, %c0_100, %c0_101] : memref<2x1x32xf32, #tpu.memory_space<vmem>>, vector<1x1x32xf32>
    %282 = vector.shape_cast %281 : vector<1x1x32xf32> to vector<1x32xf32>
    %c1_102 = arith.constant 1 : index
    %c0_103 = arith.constant 0 : index
    %c0_104 = arith.constant 0 : index
    %283 = vector.load %arg12[%c1_102, %c0_103, %c0_104] : memref<2x1x32xf32, #tpu.memory_space<vmem>>, vector<1x1x32xf32>
    %284 = vector.shape_cast %283 : vector<1x1x32xf32> to vector<1x32xf32>
    %cst_105 = arith.constant dense<0.000000e+00> : vector<16xf32>
    %285 = vector.multi_reduction <add>, %280, %cst_105 [1] : vector<16x32xf32> to vector<16xf32>
    %286 = vector.shape_cast %285 : vector<16xf32> to vector<16x1xf32>
    %cst_106 = arith.constant 3.200000e+01 : f32
    %287 = vector.broadcast %cst_106 : f32 to vector<16x1xf32>
    %288 = arith.divf %286, %287 : vector<16x1xf32>
    %289 = vector.broadcast %288 : vector<16x1xf32> to vector<16x32xf32>
    %290 = arith.subf %280, %289 : vector<16x32xf32>
    %291 = arith.mulf %290, %290 : vector<16x32xf32>
    %cst_107 = arith.constant dense<0.000000e+00> : vector<16xf32>
    %292 = vector.multi_reduction <add>, %291, %cst_107 [1] : vector<16x32xf32> to vector<16xf32>
    %293 = vector.shape_cast %292 : vector<16xf32> to vector<16x1xf32>
    %cst_108 = arith.constant 3.200000e+01 : f32
    %294 = vector.broadcast %cst_108 : f32 to vector<16x1xf32>
    %295 = arith.divf %293, %294 : vector<16x1xf32>
    %296 = vector.broadcast %288 : vector<16x1xf32> to vector<16x32xf32>
    %297 = arith.subf %280, %296 : vector<16x32xf32>
    %cst_109 = arith.constant 9.99999996E-13 : f32
    %298 = vector.broadcast %cst_109 : f32 to vector<16x1xf32>
    %299 = arith.addf %295, %298 : vector<16x1xf32>
    %300 = math.rsqrt %299 : vector<16x1xf32>
    %301 = vector.broadcast %300 : vector<16x1xf32> to vector<16x32xf32>
    %302 = arith.mulf %297, %301 : vector<16x32xf32>
    %303 = vector.broadcast %282 : vector<1x32xf32> to vector<16x32xf32>
    %304 = arith.mulf %302, %303 : vector<16x32xf32>
    %305 = vector.broadcast %284 : vector<1x32xf32> to vector<16x32xf32>
    %306 = arith.addf %304, %305 : vector<16x32xf32>
    %307 = arith.truncf %306 : vector<16x32xf32> to vector<16x32xbf16>
    %c1_110 = arith.constant 1 : index
    %c0_111 = arith.constant 0 : index
    %c0_112 = arith.constant 0 : index
    %308 = vector.load %arg13[%c1_110, %c0_111, %c0_112] : memref<2x32x64xbf16, #tpu.memory_space<vmem>>, vector<1x32x64xbf16>
    %309 = vector.shape_cast %308 : vector<1x32x64xbf16> to vector<32x64xbf16>
    %cst_113 = arith.constant dense<0.000000e+00> : vector<16x64xf32>
    %310 = tpu.matmul %307, %309, %cst_113 {dimension_numbers = #tpu.dot_dimension_numbers<[1], [0], [0], [1], [0, 0, 1, 1], [], []>} : vector<16x32xbf16>, vector<32x64xbf16>, vector<16x64xf32> -> vector<16x64xf32>
    %c1_114 = arith.constant 1 : index
    %c0_115 = arith.constant 0 : index
    %c0_116 = arith.constant 0 : index
    %311 = vector.load %arg14[%c1_114, %c0_115, %c0_116] : memref<2x1x64xf32, #tpu.memory_space<vmem>>, vector<1x1x64xf32>
    %312 = vector.shape_cast %311 : vector<1x1x64xf32> to vector<1x64xf32>
    %313 = vector.broadcast %312 : vector<1x64xf32> to vector<16x64xf32>
    %314 = arith.addf %310, %313 : vector<16x64xf32>
    %cst_117 = arith.constant 5.000000e-01 : f32
    %315 = vector.broadcast %cst_117 : f32 to vector<16x64xf32>
    %316 = arith.mulf %315, %314 : vector<16x64xf32>
    %cst_118 = arith.constant 4.471500e-02 : f32
    %317 = vector.broadcast %cst_118 : f32 to vector<16x64xf32>
    %318 = arith.mulf %317, %314 : vector<16x64xf32>
    %319 = arith.mulf %318, %314 : vector<16x64xf32>
    %320 = arith.mulf %319, %314 : vector<16x64xf32>
    %321 = arith.addf %314, %320 : vector<16x64xf32>
    %cst_119 = arith.constant 0.797884583 : f32
    %322 = vector.broadcast %cst_119 : f32 to vector<16x64xf32>
    %323 = arith.mulf %322, %321 : vector<16x64xf32>
    %324 = math.tanh %323 : vector<16x64xf32>
    %cst_120 = arith.constant 1.000000e+00 : f32
    %325 = vector.broadcast %cst_120 : f32 to vector<16x64xf32>
    %326 = arith.addf %325, %324 : vector<16x64xf32>
    %327 = arith.mulf %316, %326 : vector<16x64xf32>
    %328 = arith.truncf %327 : vector<16x64xf32> to vector<16x64xbf16>
    %c1_121 = arith.constant 1 : index
    %c0_122 = arith.constant 0 : index
    %c0_123 = arith.constant 0 : index
    %329 = vector.load %arg15[%c1_121, %c0_122, %c0_123] : memref<2x64x32xbf16, #tpu.memory_space<vmem>>, vector<1x64x32xbf16>
    %330 = vector.shape_cast %329 : vector<1x64x32xbf16> to vector<64x32xbf16>
    %cst_124 = arith.constant dense<0.000000e+00> : vector<16x32xf32>
    %331 = tpu.matmul %328, %330, %cst_124 {dimension_numbers = #tpu.dot_dimension_numbers<[1], [0], [0], [1], [0, 0, 1, 1], [], []>} : vector<16x64xbf16>, vector<64x32xbf16>, vector<16x32xf32> -> vector<16x32xf32>
    %c1_125 = arith.constant 1 : index
    %c0_126 = arith.constant 0 : index
    %c0_127 = arith.constant 0 : index
    %332 = vector.load %arg16[%c1_125, %c0_126, %c0_127] : memref<2x1x32xf32, #tpu.memory_space<vmem>>, vector<1x1x32xf32>
    %333 = vector.shape_cast %332 : vector<1x1x32xf32> to vector<1x32xf32>
    %334 = vector.broadcast %333 : vector<1x32xf32> to vector<16x32xf32>
    %335 = arith.addf %331, %334 : vector<16x32xf32>
    %336 = arith.addf %335, %306 : vector<16x32xf32>
    %c1_128 = arith.constant 1 : index
    %c0_129 = arith.constant 0 : index
    %c0_130 = arith.constant 0 : index
    %337 = vector.load %arg17[%c1_128, %c0_129, %c0_130] : memref<2x1x32xf32, #tpu.memory_space<vmem>>, vector<1x1x32xf32>
    %338 = vector.shape_cast %337 : vector<1x1x32xf32> to vector<1x32xf32>
    %c1_131 = arith.constant 1 : index
    %c0_132 = arith.constant 0 : index
    %c0_133 = arith.constant 0 : index
    %339 = vector.load %arg18[%c1_131, %c0_132, %c0_133] : memref<2x1x32xf32, #tpu.memory_space<vmem>>, vector<1x1x32xf32>
    %340 = vector.shape_cast %339 : vector<1x1x32xf32> to vector<1x32xf32>
    %cst_134 = arith.constant dense<0.000000e+00> : vector<16xf32>
    %341 = vector.multi_reduction <add>, %336, %cst_134 [1] : vector<16x32xf32> to vector<16xf32>
    %342 = vector.shape_cast %341 : vector<16xf32> to vector<16x1xf32>
    %cst_135 = arith.constant 3.200000e+01 : f32
    %343 = vector.broadcast %cst_135 : f32 to vector<16x1xf32>
    %344 = arith.divf %342, %343 : vector<16x1xf32>
    %345 = vector.broadcast %344 : vector<16x1xf32> to vector<16x32xf32>
    %346 = arith.subf %336, %345 : vector<16x32xf32>
    %347 = arith.mulf %346, %346 : vector<16x32xf32>
    %cst_136 = arith.constant dense<0.000000e+00> : vector<16xf32>
    %348 = vector.multi_reduction <add>, %347, %cst_136 [1] : vector<16x32xf32> to vector<16xf32>
    %349 = vector.shape_cast %348 : vector<16xf32> to vector<16x1xf32>
    %cst_137 = arith.constant 3.200000e+01 : f32
    %350 = vector.broadcast %cst_137 : f32 to vector<16x1xf32>
    %351 = arith.divf %349, %350 : vector<16x1xf32>
    %352 = vector.broadcast %344 : vector<16x1xf32> to vector<16x32xf32>
    %353 = arith.subf %336, %352 : vector<16x32xf32>
    %cst_138 = arith.constant 9.99999996E-13 : f32
    %354 = vector.broadcast %cst_138 : f32 to vector<16x1xf32>
    %355 = arith.addf %351, %354 : vector<16x1xf32>
    %356 = math.rsqrt %355 : vector<16x1xf32>
    %357 = vector.broadcast %356 : vector<16x1xf32> to vector<16x32xf32>
    %358 = arith.mulf %353, %357 : vector<16x32xf32>
    %359 = vector.broadcast %338 : vector<1x32xf32> to vector<16x32xf32>
    %360 = arith.mulf %358, %359 : vector<16x32xf32>
    %361 = vector.broadcast %340 : vector<1x32xf32> to vector<16x32xf32>
    %362 = arith.addf %360, %361 : vector<16x32xf32>
    %363 = vector.shape_cast %362 : vector<16x32xf32> to vector<2x8x32xf32>
    %364 = vector.extract_strided_slice %363 {offsets = [0, 0, 0], sizes = [2, 1, 32], strides = [1, 1, 1]} : vector<2x8x32xf32> to vector<2x1x32xf32>
    %365 = vector.shape_cast %364 : vector<2x1x32xf32> to vector<2x32xf32>
    %366 = arith.truncf %365 : vector<2x32xf32> to vector<2x32xbf16>
    %c0_139 = arith.constant 0 : index
    %c0_140 = arith.constant 0 : index
    %367 = vector.load %arg19[%c0_139, %c0_140] : memref<32x128xbf16, #tpu.memory_space<vmem>>, vector<32x128xbf16>
    %cst_141 = arith.constant dense<0.000000e+00> : vector<2x128xf32>
    %368 = tpu.matmul %366, %367, %cst_141 {dimension_numbers = #tpu.dot_dimension_numbers<[1], [0], [0], [1], [0, 0, 1, 1], [], []>} : vector<2x32xbf16>, vector<32x128xbf16>, vector<2x128xf32> -> vector<2x128xf32>
    %c0_142 = arith.constant 0 : index
    %c0_143 = arith.constant 0 : index
    %369 = vector.load %arg20[%c0_142, %c0_143] : memref<1x128xf32, #tpu.memory_space<vmem>>, vector<1x128xf32>
    %370 = vector.broadcast %369 : vector<1x128xf32> to vector<2x128xf32>
    %371 = arith.addf %368, %370 : vector<2x128xf32>
    %cst_144 = arith.constant 0.000000e+00 : f32
    %372 = vector.broadcast %cst_144 : f32 to vector<2x128xf32>
    %373 = arith.subf %372, %371 : vector<2x128xf32>
    %374 = math.exp %373 : vector<2x128xf32>
    %cst_145 = arith.constant 1.000000e+00 : f32
    %375 = vector.broadcast %cst_145 : f32 to vector<2x128xf32>
    %376 = arith.addf %375, %374 : vector<2x128xf32>
    %cst_146 = arith.constant 1.000000e+00 : f32
    %377 = vector.broadcast %cst_146 : f32 to vector<2x128xf32>
    %378 = arith.divf %377, %376 : vector<2x128xf32>
    %c0_147 = arith.constant 0 : index
    %c0_148 = arith.constant 0 : index
    %379 = vector.load %arg21[%c0_147, %c0_148] : memref<2x128xf32, #tpu.memory_space<vmem>>, vector<2x128xf32>
    tpu.vector_store %arg21[%c0_147, %c0_148], %378 {strides = array<i32>} : memref<2x128xf32, #tpu.memory_space<vmem>>, vector<2x128xf32>,
    return
  }
}

</mosaic_0001>

<bundles_post_ra>
// kernel: discriminator_forward.1
= control target key start
LH: loop header
LB: loop body
LE: loop exit
PB: predicated region body
PF: predicated region fallthrough
CT: control target
= control target key end

     0   :  { %v2366_v0 = vmov 0   ;;  %vm108_vm0 = vcmask 1041408   ;;  %v71_v24 = vlaneseq  ;;  %v2367_v28 = vmov 0.0   ;;  %s3038_s24 = smov 16   ;;  %s3013_s0 = inlined_call_operand.vmem [shape: s32[16,1], index: 0, kind: input, shape index: {}]   ;;  %s3014_s2 = inlined_call_operand.vmem [shape: f32[100,32], index: 2, kind: input, shape index: {}]   ;;  %s3015_s4 = inlined_call_operand.vmem [shape: f32[2,32], index: 4, kind: input, shape index: {}]   ;;  %s3016_s3 = inlined_call_operand.vmem [shape: f32[16,32], index: 3, kind: input, shape index: {}]   ;;  %s3017_s5 = inlined_call_operand.vmem [shape: f32[1,32], index: 5, kind: input, shape index: {}]   ;;  %s3018_s6 = inlined_call_operand.vmem [shape: f32[1,32], index: 6, kind: input, shape index: {}]   ;;  %s3019_s8 = inlined_call_operand.vmem [shape: f32[2,1,96], index: 8, kind: input, shape index: {}]   ;;  %s3020_s7 = inlined_call_operand.vmem [shape: bf16[2,32,96], index: 7, kind: input, shape index: {}]   ;;  %s3021_s1 = inlined_call_operand.vmem [shape: s32[2,8], index: 1, kind: input, shape index: {}]   ;;  %s3022_s10 = inlined_call_operand.vmem [shape: f32[2,1,32], index: 10, kind: input, shape index: {}]   ;;  %s3023_s9 = inlined_call_operand.vmem [shape: bf16[2,32,32], index: 9, kind: input, shape index: {}]   ;;  %s3024_s11 = inlined_call_operand.vmem [shape: f32[2,1,32], index: 11, kind: input, shape index: {}]   ;;  %s3025_s12 = inlined_call_operand.vmem [shape: f32[2,1,32], index: 12, kind: input, shape index: {}]   ;;  %s3026_s14 = inlined_call_operand.vmem [shape: f32[2,1,64], index: 14, kind: input, shape index: {}]   ;;  %s3027_s13 = inlined_call_operand.vmem [shape: bf16[2,32,64], index: 13, kind: input, shape index: {}]   ;;  %s3028_s16 = inlined_call_operand.vmem [shape: f32[2,1,32], index: 16, kind: input, shape index: {}]   ;;  %s3029_s15 = inlined_call_operand.vmem [shape: bf16[2,64,32], index: 15, kind: input, shape index: {}]   ;;  %s3030_s17 = inlined_call_operand.vmem [shape: f32[2,1,32], index: 17, kind: input, shape index: {}]   ;;  %s3031_s18 = inlined_call_operand.vmem [shape: f32[2,1,32], index: 18, kind: input, shape index: {}]   ;;  %s3032_s20 = inlined_call_operand.vmem [shape: f32[1,128], index: 20, kind: input, shape index: {}]   ;;  %s3033_s19 = inlined_call_operand.vmem [shape: bf16[32,128], index: 19, kind: input, shape index: {}]   ;;  %s3034_s21 = inlined_call_operand.vmem [shape: f32[2,128], index: 21, kind: output, shape index: {}]  }
   0x1   :  { %3039 = sst [smem:[#allocation2_spill]] %s3013_s0  ;;  %2177 = vset.pattern.permute.xlu0 %v2366_v0  ;;  %vm104_vm3 = vcmask 818176   ;;  %vm135_vm4 = vcmask 261120   ;;  %v2368_v42 = vmov 32.0   ;;  %v2145_v59 = vld [vmem:[%s3020_s7 + $0x8] sm:$0xff]  ;;  %v2144_v61 = vld [vmem:[%s3020_s7] sm:$0xff] }
   0x2   :  { %3040 = sst [smem:[#allocation3_spill]] %s3014_s2  ;;  %v72_v26 = vand.u32 127, %v71_v24  ;;  %2268 = vrcp.f32 %v2368_v42  ;;  %233 = vmatpush.bf16.msra.mxu1 %v2145_v59  ;;  %vm308_vm12 = vcmask 64512   ;;  %vm597_vm13 = vcmask 1043456   ;;  %s3037_s2 = smov 24  }
   0x3   :  { %3041 = sst [smem:[#allocation4_spill]] %s3015_s4  ;;  %vm787_vm14 = vcmask 130048   ;;  %vm790_vm15 = vcmask 195584  }
   0x4   :  { %3042 = sst [smem:[#allocation5_spill]] %s3016_s3 }
   0x5   :  { %3043 = sst [smem:[#allocation6_spill]] %s3017_s5  ;;  %s2369_s5 = smov 120  }
   0x6   :  { %3044 = sst [smem:[#allocation7_spill]] %s3018_s6  ;;  %234 = vmatpush.bf16.msra.mxu1 %v2144_v61  ;;  %s2373_s6 = smov 64  }
   0x7   :  { %s3045_s26 = sld [smem:[#allocation2_spill]] }
   0x8   :  { %s3046_s28 = sld [smem:[#allocation3_spill]]  ;;  %v2269_v43 = vpop.eup %2268 }
   0x9   :  { %s3047_s0 = sld [smem:[#allocation5_spill]]  ;;  %v143_v44 = vmul.f32 32.0, %v2269_v43  ;;  %vm147_vm5 = vweird.f32 %v2269_v43 }
   0xa   :  { %s3048_s30 = sld [smem:[#allocation4_spill]] }
   0xb   :  { %v144_v45 = vsub.f32 1.0, %v143_v44  ;;  %s3049_s4 = sld [smem:[#allocation6_spill]] }
   0xc   :  { %s3050_s3 = sld [smem:[#allocation7_spill]] }
   0xd   :  { %v69_v1 = vld [vmem:[%s3045_s26] sm:$0xff]  ;;  %v70_v10 = vld [vmem:[%s3045_s26 + $0x8] sm:$0xff]  ;;  %v145_v46 = vmul.f32 %v2269_v43, %v144_v45  ;;  %s2372_s26 = smov 104  }
   0xe   :  { %v96_v2 = vld [vmem:[%s3046_s28 + $0x60] sm:$0xf]  ;;  %74 = vperm.xlu0 %2177, %v69_v1   ;;  %v94_v4 = vld [vmem:[%s3046_s28 + $0x50] sm:$0xff]  ;;  %v95_v5 = vld [vmem:[%s3046_s28 + $0x58] sm:$0xff] }
   0xf   :  { %v103_v3 = vpack.c.bf16 %v96_v2, %v96_v2  ;;  %v102_v7 = vpack.c.bf16 %v95_v5, %v94_v4  ;;  %v92_v8 = vld [vmem:[%s3046_s28 + $0x40] sm:$0xff]  ;;  %v93_v9 = vld [vmem:[%s3046_s28 + $0x48] sm:$0xff]  ;;  %v90_v12 = vld [vmem:[%s3046_s28 + $0x30] sm:$0xff]  ;;  %v146_v47 = vadd.f32 %v2269_v43, %v145_v46 }
  0x10   :  { %v101_v11 = vpack.c.bf16 %v93_v9, %v92_v8  ;;  %v91_v13 = vld [vmem:[%s3046_s28 + $0x38] sm:$0xff]  ;;  %v88_v15 = vld [vmem:[%s3046_s28 + $0x20] sm:$0xff]  ;;  %v89_v16 = vld [vmem:[%s3046_s28 + $0x28] sm:$0xff] }
  0x11   :  { %v110_v6 = vsel %vm108_vm0, %v103_v3, 0  ;;  %v100_v14 = vpack.c.bf16 %v91_v13, %v90_v12  ;;  %v99_v17 = vpack.c.bf16 %v89_v16, %v88_v15  ;;  %v86_v18 = vld [vmem:[%s3046_s28 + $0x10] sm:$0xff]  ;;  %v87_v19 = vld [vmem:[%s3046_s28 + $0x18] sm:$0xff]  ;;  %v84_v21 = vld [vmem:[%s3046_s28] sm:$0xff]  ;;  %v2540_v48 = vsel %vm147_vm5, %v2269_v43, %v146_v47 }
  0x12   :  { %113 = vmatpush.bf16.msra.mxu0 %v110_v6  ;;  %v98_v20 = vpack.c.bf16 %v87_v19, %v86_v18  ;;  %v85_v22 = vld [vmem:[%s3046_s28 + $0x8] sm:$0xff]  ;;  %v126_v32 = vld [vmem:[%s3047_s0] sm:$0xff]  ;;  %s2370_s28 = smov 112  }
  0x13   :  { %v97_v23 = vpack.c.bf16 %v85_v22, %v84_v21  ;;  %v2248_v33 = vld [vmem:[%s3048_s30] ss:$0 sm:$0xff]  ;;  %s2371_s30 = smov 96  }
  0x14   :  { %v2249_v16 = vld [vmem:[%s3049_s4] ss:$0 sm:$0xff] }
  0x15   :  { %v2250_v21 = vld [vmem:[%s3050_s3] ss:$0 sm:$0xff] }
  0x16   :  { %114 = vmatpush.bf16.msra.mxu0 %v102_v7  ;;  %77 = vperm.xlu0 %2177, %v70_v10  }
  0x1a   :  { %115 = vmatpush.bf16.msra.mxu0 %v101_v11 }
  0x1e   :  { %116 = vmatpush.bf16.msra.mxu0 %v100_v14 }
  0x22   :  { %117 = vmatpush.bf16.msra.mxu0 %v99_v17 }
  0x26   :  { %118 = vmatpush.bf16.msra.mxu0 %v98_v20 }
  0x2a   :  { %119 = vmatpush.bf16.msra.mxu0 %v97_v23 }
  0x80   :  { %v75_v25 = vpop.permute.xlu0 %74 }
  0x81   :  { %vm79_vm1 = vcmp.eq.s32.totalorder %v75_v25, %v72_v26 }
  0x82   :  { %v81_v29 = vsel %vm79_vm1, 1.0, %v2367_v28 }
  0x88   :  { %v78_v27 = vpop.permute.xlu0 %77 }
  0x89   :  { %vm80_vm2 = vcmp.eq.s32.totalorder %v78_v27, %v72_v26  ;;  %v2251_v26 = vld [vmem:[%s3019_s8] ss:$0 sm:$0xff] }
  0x8a   :  { %v82_v30 = vsel %vm80_vm2, 1.0, %v2367_v28 }
  0x8b   :  { %v83_v31 = vpack.c.bf16 %v82_v30, %v81_v29 }
  0x8d   :  { %1986 = vmatmul.msk.bf16.vlgmr.msra.gmra.mxu0 %vm104_vm3, %v83_v31 }
 0x10a   :  { %v121_v34 = vpop.f32.mrf.mxu0 }
 0x10b   :  { %v127_v35 = vadd.f32 %v126_v32, %v121_v34 }
 0x10d   :  { %v131_v36 = vadd.f32 %v2248_v33, %v127_v35 }
 0x10f   :  { %v136_v37 = vsel %vm135_vm4, %v131_v36, 0.0 }
 0x110   :  { %137 = vadd.xlane.f32.xlu1 %v136_v37 }
 0x112   :  { %v123_v38 = vpop.f32.mrf.mxu0 }
 0x113   :  { %v128_v39 = vadd.f32 %v126_v32, %v123_v38 }
 0x115   :  { %v132_v40 = vadd.f32 %v2248_v33, %v128_v39 }
 0x117   :  { %v139_v41 = vsel %vm135_vm4, %v132_v40, 0.0 }
 0x118   :  { %140 = vadd.xlane.f32.xlu1 %v139_v41 }
 0x183   :  { %v138_v49 = vpop.xlane.xlu1 %137 }
 0x184   :  { %v149_v50 = vmul.f32 %v2540_v48, %v138_v49 }
 0x186   :  { %v151_v51 = vsub.f32 %v131_v36, %v149_v50 }
 0x188   :  { %v153_v52 = vmul.f32 %v151_v51, %v151_v51 }
 0x18a   :  { %v155_v53 = vsel %vm135_vm4, %v153_v52, 0.0 }
 0x18b   :  { %156 = vadd.xlane.f32.xlu2 %v155_v53  ;;  %v141_v54 = vpop.xlane.xlu1 %140 }
 0x18c   :  { %v150_v55 = vmul.f32 %v2540_v48, %v141_v54 }
 0x18e   :  { %v152_v56 = vsub.f32 %v132_v40, %v150_v55 }
 0x190   :  { %v154_v57 = vmul.f32 %v152_v56, %v152_v56 }
 0x192   :  { %v158_v58 = vsel %vm135_vm4, %v154_v57, 0.0 }
 0x193   :  { %159 = vadd.xlane.f32.xlu2 %v158_v58 }
 0x1fe   :  { %v157_v60 = vpop.xlane.xlu2 %156 }
 0x1ff   :  { %v161_v62 = vmul.f32 %v157_v60, %v2540_v48 }
 0x201   :  { %v163_v63 = vadd.f32 1e-12, %v161_v62 }
 0x203   :  { %2270 = vrsqrt.f32 %v163_v63  ;;  %vm171_vm7 = vweird.f32 %v163_v63 }
 0x206   :  { %v160_v0 = vpop.xlane.xlu2 %159 }
 0x207   :  { %v162_v1 = vmul.f32 %v160_v0, %v2540_v48 }
 0x209   :  { %v2271_v2 = vpop.eup %2270  ;;  %v164_v3 = vadd.f32 1e-12, %v162_v1 }
 0x20a   :  { %v166_v4 = vmul.f32 %v2271_v2, %v163_v63  ;;  %vm172_vm6 = vweird.f32 %v2271_v2 }
 0x20b   :  { %2272 = vrsqrt.f32 %v164_v3  ;;  %vm173_vm8 = vmor %vm171_vm7, %vm172_vm6  ;;  %vm181_vm10 = vweird.f32 %v164_v3  ;;  %vm982_vm7 = vcmask 523264  }
 0x20c   :  { %v167_v5 = vmul.f32 %v2271_v2, %v166_v4 }
 0x20e   :  { %v168_v6 = vmul.f32 0.5, %v167_v5 }
 0x210   :  { %v169_v7 = vsub.f32 1.5, %v168_v6 }
 0x211   :  { %v2273_v8 = vpop.eup %2272 }
 0x212   :  { %v170_v9 = vmul.f32 %v2271_v2, %v169_v7  ;;  %v176_v10 = vmul.f32 %v2273_v8, %v164_v3  ;;  %vm182_vm9 = vweird.f32 %v2273_v8 }
 0x213   :  { %vm183_vm11 = vmor %vm181_vm10, %vm182_vm9 }
 0x214   :  { %v177_v11 = vmul.f32 %v2273_v8, %v176_v10  ;;  %v174_v12 = vsel %vm173_vm8, %v2271_v2, %v170_v9  ;;  %v197_v9 = vld [vmem:[%s3021_s1] sm:$0x3]  ;;  %s2374_s1 = smov 8  }
 0x215   :  { %v185_v15 = vmul.f32 %v174_v12, %v151_v51  ;;  %v198_v10 = vcvt.s32.f32 %v197_v9 }
 0x216   :  { %v178_v13 = vmul.f32 0.5, %v177_v11 }
 0x217   :  { %v190_v20 = vmul.f32 %v2249_v16, %v185_v15  ;;  %v199_v11 = vsub.f32 1.0, %v198_v10 }
 0x218   :  { %v179_v14 = vsub.f32 1.5, %v178_v13 }
 0x219   :  { %v2560_v23 = vadd.f32 %v2250_v21, %v190_v20  ;;  %v200_v12 = vmul.f32 -1e+09, %v199_v11 }
 0x21a   :  { %v180_v17 = vmul.f32 %v2273_v8, %v179_v14 }
 0x21c   :  { %v184_v18 = vsel %vm183_vm11, %v2273_v8, %v180_v17 }
 0x21d   :  { %v186_v19 = vmul.f32 %v184_v18, %v152_v56 }
 0x21f   :  { %v191_v22 = vmul.f32 %v2249_v16, %v186_v19  ;;  %v202_v16 = vrot.slane %v200_v12, 1 }
 0x221   :  { %v2562_v24 = vadd.f32 %v2250_v21, %v191_v22  ;;  %v2618_v17 = vperm.slane %v202_v16, 0 }
 0x223   :  { %v203_v25 = vpack.c.bf16 %v2562_v24, %v2560_v23 }
 0x225   :  { %1995 = vmatmul.msk.bf16.vlgmr.msra.gmra.mxu1 %vm135_vm4, %v203_v25 }
 0x2a2   :  { %v236_v27 = vpop.f32.mrf.mxu1 }
 0x2a3   :  { %v237_v28 = vadd.f32 %v2251_v26, %v236_v27 }
 0x2a5   :  { %273 = vrot.lane.b32.xlu2 %v237_v28, %s2369_s5  ;;  %279 = vrot.lane.b32.xlu1 %v237_v28, %s2370_s28  ;;  %v291_v36 = vpack.c.bf16 %v237_v28, %v237_v28  ;;  %v241_v38 = vmul.f32 0.35355338, %v237_v28 }
 0x2a7   :  { %v304_v37 = vunpack.c.l.b16 %v291_v36  ;;  %v263_v8 = vpack.c.bf16 %v241_v38, %v241_v38 }
 0x2a9   :  { %v2581_v39 = vpack.c.b16 %v304_v37, %v304_v37 }
 0x2aa   :  { %v238_v29 = vpop.f32.mrf.mxu1 }
 0x2ab   :  { %v239_v30 = vadd.f32 %v2251_v26, %v238_v29 }
 0x2ad   :  { %275 = vrot.lane.b32.xlu0 %v239_v30, %s2369_s5  ;;  %v292_v31 = vpack.c.bf16 %v239_v30, %v239_v30  ;;  %v2178_v34 = vpack.i.bf16 %v239_v30, %v237_v28  ;;  %v242_v35 = vmul.f32 0.35355338, %v239_v30 }
 0x2af   :  { %v329_v32 = vunpack.c.l.b16 %v292_v31  ;;  %v2183_v40 = vpack.i.bf16 %v242_v35, %v241_v38  ;;  %v264_v44 = vpack.c.bf16 %v242_v35, %v242_v35 }
 0x2b1   :  { %v2573_v33 = vpack.c.b16 %v329_v32, %v329_v32 }
 0x2b3   :  { %331 = vrot.lane.b32.xlu2 %v2573_v33, %s2371_s30 }
 0x2b5   :  { %2179 = vrot.lane.b32.xlu0 %v2178_v34, %s2372_s26 }
 0x2bb   :  { %247 = vrot.lane.b32.xlu2 %v242_v35, %s2369_s5 }
 0x2bd   :  { %281 = vrot.lane.b32.xlu0 %v239_v30, %s2370_s28 }
 0x2c3   :  { %245 = vrot.lane.b32.xlu2 %v241_v38, %s2369_s5 }
 0x2c5   :  { %306 = vrot.lane.b32.xlu0 %v2581_v39, %s2371_s30 }
 0x2cb   :  { %2184 = vrot.lane.b32.xlu2 %v2183_v40, %s2372_s26 }
 0x2ff   :  { %v274_v41 = vpop.permute.xlu2 %273 }
 0x300   :  { %v293_v49 = vpack.c.bf16 %v274_v41, %v274_v41 }
 0x302   :  { %v353_v52 = vunpack.c.l.b16 %v293_v49 }
 0x304   :  { %v354_v55 = vpack.c.b16 %v353_v52, %v353_v52  ;;  %v2634_v52 = vperm.slane %v200_v12, 0 }
 0x30d   :  { %v332_v42 = vpop.permute.xlu2 %331 }
 0x30e   :  { %v337_v43 = vsel %vm308_vm12, %v332_v42, 0 }
 0x30f   :  { %346 = vmatpush.bf16.xpose.msra.mxu3 %v337_v43 }
 0x315   :  { %v248_v15 = vpop.permute.xlu2 %247 }
 0x316   :  { %1997 = vmatmul.msk.bf16.vlgmr.msra.gmra.mxu3 %vm308_vm12, %v264_v44  ;;  %v266_v28 = vpack.c.bf16 %v248_v15, %v248_v15 }
 0x317   :  { %v280_v45 = vpop.permute.xlu1 %279 }
 0x318   :  { %v295_v46 = vpack.c.bf16 %v280_v45, %v280_v45 }
 0x31a   :  { %v401_v47 = vunpack.c.l.b16 %v295_v46 }
 0x31c   :  { %v2588_v50 = vpack.c.b16 %v401_v47, %v401_v47 }
 0x31d   :  { %v246_v26 = vpop.permute.xlu2 %245 }
 0x31e   :  { %403 = vrot.lane.b32.xlu0 %v2588_v50, %s2371_s30  ;;  %v265_v29 = vpack.c.bf16 %v246_v26, %v246_v26 }
 0x31f   :  { %v276_v51 = vpop.permute.xlu0 %275 }
 0x320   :  { %v294_v53 = vpack.c.bf16 %v276_v51, %v276_v51 }
 0x322   :  { %v377_v54 = vunpack.c.l.b16 %v294_v53 }
 0x324   :  { %v2592_v56 = vpack.c.b16 %v377_v54, %v377_v54 }
 0x325   :  { %v2185_v36 = vpop.permute.xlu2 %2184 }
 0x326   :  { %379 = vrot.lane.b32.xlu1 %v2592_v56, %s2371_s30  ;;  %355 = vrot.lane.b32.xlu0 %v354_v55, %s2371_s30  ;;  %v2186_v41 = vunpack.i.l.bf16 %v2185_v36  ;;  %v2187_v42 = vunpack.i.h.bf16 %v2185_v36 }
 0x327   :  { %v2180_v57 = vpop.permute.xlu0 %2179 }
 0x328   :  { %v2182_v58 = vunpack.i.h.bf16 %v2180_v57  ;;  %v2181_v59 = vunpack.i.l.bf16 %v2180_v57  ;;  %v269_v43 = vpack.c.bf16 %v2186_v41, %v2186_v41  ;;  %v270_v45 = vpack.c.bf16 %v2187_v42, %v2187_v42 }
 0x32a   :  { %v298_v60 = vpack.c.bf16 %v2182_v58, %v2182_v58  ;;  %v297_v62 = vpack.c.bf16 %v2181_v59, %v2181_v59 }
 0x32c   :  { %v473_v61 = vunpack.c.l.b16 %v298_v60  ;;  %v449_v1 = vunpack.c.l.b16 %v297_v62 }
 0x32e   :  { %v2597_v63 = vpack.c.b16 %v473_v61, %v473_v61  ;;  %251 = vrot.lane.b32.xlu1 %v241_v38, %s2370_s28  ;;  %v2602_v2 = vpack.c.b16 %v449_v1, %v449_v1 }
 0x32f   :  { %v282_v0 = vpop.permute.xlu0 %281 }
 0x330   :  { %475 = vrot.lane.b32.xlu0 %v2597_v63, %s2371_s30  ;;  %v296_v3 = vpack.c.bf16 %v282_v0, %v282_v0 }
 0x332   :  { %v425_v5 = vunpack.c.l.b16 %v296_v3 }
 0x334   :  { %v2608_v7 = vpack.c.b16 %v425_v5, %v425_v5 }
 0x336   :  { %451 = vrot.lane.b32.xlu1 %v2602_v2, %s2371_s30 }
 0x337   :  { %v307_v4 = vpop.permute.xlu0 %306 }
 0x338   :  { %253 = vrot.lane.b32.xlu0 %v242_v35, %s2370_s28  ;;  %v313_v6 = vsel %vm308_vm12, %v307_v4, 0 }
 0x339   :  { %322 = vmatpush.bf16.xpose.msra.mxu2 %v313_v6 }
 0x33e   :  { %427 = vrot.lane.b32.xlu1 %v2608_v7, %s2371_s30 }
 0x340   :  { %635 = vrot.lane.b32.xlu0 %v354_v55, %s2373_s6  ;;  %1996 = vmatmul.msk.bf16.vlgmr.msra.gmra.mxu2 %vm308_vm12, %v263_v8 }
 0x390   :  { %v404_v13 = vpop.permute.xlu0 %403 }
 0x391   :  { %v409_v14 = vsel %vm308_vm12, %v404_v13, 0 }
 0x392   :  { %418 = vmatpush.bf16.xpose.msrb.mxu3 %v409_v14 }
 0x398   :  { %v380_v18 = vpop.permute.xlu1 %379  ;;  %v356_v19 = vpop.permute.xlu0 %355 }
 0x399   :  { %v348_v20 = vpop.f32.mrf.mxu3  ;;  %v361_v21 = vsel %vm308_vm12, %v356_v19, 0  ;;  %v385_v22 = vsel %vm308_vm12, %v380_v18, 0 }
 0x39a   :  { %v349_v25 = vadd.f32 %v348_v20, %v2618_v17  ;;  %370 = vmatpush.bf16.xpose.msrb.mxu1 %v361_v21  ;;  %394 = vmatpush.bf16.xpose.msrb.mxu2 %v385_v22 }
 0x39c   :  { %v499_v27 = vsel %vm308_vm12, %v349_v25, -inf }
 0x39d   :  { %500 = vmax.xlane.f32.xlu2 %v499_v27 }
 0x3a0   :  { %v252_v30 = vpop.permute.xlu1 %251 }
 0x3a1   :  { %v267_v31 = vpack.c.bf16 %v252_v30, %v252_v30  ;;  %v350_v32 = vpop.f32.mrf.mxu3  ;;  %1998 = vmatmul.msk.bf16.vlgmr.msrb.gmra.mxu1 %vm308_vm12, %v265_v29  ;;  %1999 = vmatmul.msk.bf16.vlgmr.msrb.gmra.mxu2 %vm308_vm12, %v266_v28 }
 0x3a2   :  { %v476_v34 = vpop.permute.xlu0 %475 }
 0x3a3   :  { %v481_v35 = vsel %vm308_vm12, %v476_v34, 0  ;;  %2000 = vmatmul.msk.bf16.vlgmr.msrb.gmra.mxu3 %vm308_vm12, %v267_v31 }
 0x3a4   :  { %490 = vmatpush.bf16.xpose.msra.mxu3 %v481_v35 }
 0x3a8   :  { %v452_v37 = vpop.permute.xlu1 %451 }
 0x3a9   :  { %v457_v38 = vsel %vm308_vm12, %v452_v37, 0 }
 0x3aa   :  { %v254_v40 = vpop.permute.xlu0 %253  ;;  %466 = vmatpush.bf16.xpose.msra.mxu2 %v457_v38 }
 0x3ab   :  { %v268_v51 = vpack.c.bf16 %v254_v40, %v254_v40 }
 0x3b0   :  { %v428_v44 = vpop.permute.xlu1 %427 }
 0x3b1   :  { %v433_v46 = vsel %vm308_vm12, %v428_v44, 0  ;;  %2002 = vmatmul.msk.bf16.vlgmr.msra.gmra.mxu2 %vm308_vm12, %v269_v43 }
 0x3b2   :  { %v636_v47 = vpop.permute.xlu0 %635  ;;  %442 = vmatpush.bf16.xpose.msra.mxu1 %v433_v46 }
 0x3b3   :  { %v641_v49 = vsel %vm597_vm13, %v636_v47, 0  ;;  %2003 = vmatmul.msk.bf16.vlgmr.msra.gmra.mxu3 %vm308_vm12, %v270_v45 }
 0x3b4   :  { %650 = vmatpush.bf16.msrb.mxu2 %v641_v49 }
 0x3b9   :  { %2001 = vmatmul.msk.bf16.vlgmr.msra.gmra.mxu1 %vm308_vm12, %v268_v51 }
 0x3c3   :  { %v324_v53 = vpop.f32.mrf.mxu2 }
 0x3c4   :  { %v325_v54 = vadd.f32 %v324_v53, %v2634_v52 }
 0x3c6   :  { %v496_v55 = vsel %vm308_vm12, %v325_v54, -inf }
 0x3c7   :  { %497 = vmax.xlane.f32.xlu0 %v496_v55 }
 0x3cb   :  { %v326_v57 = vpop.f32.mrf.mxu2 }
 0x410   :  { %v501_v8 = vpop.xlane.xlu2 %500 }
 0x411   :  { %v521_v10 = vsub.f32 %v349_v25, %v501_v8 }
 0x413   :  { %v530_v11 = vmul.f32 1.442695, %v521_v10 }
 0x415   :  { %2274 = vpow2.f32 %v530_v11 }
 0x41b   :  { %v2275_v25 = vpop.eup %2274 }
 0x41c   :  { %v547_v29 = vsel %vm308_vm12, %v2275_v25, 0.0 }
 0x41e   :  { %v372_v58 = vpop.f32.mrf.mxu1 }
 0x41f   :  { %v373_v59 = vadd.f32 %v372_v58, %v2634_v52 }
 0x421   :  { %v502_v60 = vsel %vm308_vm12, %v373_v59, -inf }
 0x422   :  { %503 = vmax.xlane.f32.xlu2 %v502_v60 }
 0x424   :  { %v396_v61 = vpop.f32.mrf.mxu2 }
 0x425   :  { %v397_v62 = vadd.f32 %v396_v61, %v2618_v17 }
 0x426   :  { %v374_v0 = vpop.f32.mrf.mxu1  ;;  %v420_v1 = vpop.f32.mrf.mxu3 }
 0x427   :  { %v421_v3 = vadd.f32 %v420_v1, %v2634_v52  ;;  %v505_v4 = vsel %vm308_vm12, %v397_v62, -inf }
 0x428   :  { %506 = vmax.xlane.f32.xlu1 %v505_v4 }
 0x429   :  { %v508_v5 = vsel %vm308_vm12, %v421_v3, -inf }
 0x42a   :  { %509 = vmax.xlane.f32.xlu0 %v508_v5 }
 0x42c   :  { %v398_v6 = vpop.f32.mrf.mxu2 }
 0x42e   :  { %v422_v9 = vpop.f32.mrf.mxu3 }
 0x434   :  { %v468_v12 = vpop.f32.mrf.mxu2 }
 0x435   :  { %v2655_v32 = vadd.f32 %v468_v12, %v2634_v52 }
 0x436   :  { %v444_v13 = vpop.f32.mrf.mxu1  ;;  %v492_v14 = vpop.f32.mrf.mxu3 }
 0x437   :  { %v445_v15 = vadd.f32 %v444_v13, %v2618_v17  ;;  %v493_v16 = vadd.f32 %v492_v14, %v2618_v17  ;;  %v514_v34 = vsel %vm308_vm12, %v2655_v32, -inf }
 0x439   :  { %v517_v18 = vsel %vm308_vm12, %v493_v16, -inf  ;;  %v511_v19 = vsel %vm308_vm12, %v445_v15, -inf }
 0x43a   :  { %518 = vmax.xlane.f32.xlu2 %v517_v18  ;;  %512 = vmax.xlane.f32.xlu1 %v511_v19  ;;  %v498_v20 = vpop.xlane.xlu0 %497 }
 0x43b   :  { %v520_v21 = vsub.f32 %v325_v54, %v498_v20 }
 0x43c   :  { %v470_v22 = vpop.f32.mrf.mxu2 }
 0x43d   :  { %v528_v26 = vmul.f32 1.442695, %v520_v21 }
 0x43e   :  { %v446_v27 = vpop.f32.mrf.mxu1  ;;  %v494_v28 = vpop.f32.mrf.mxu3  ;;  %614 = vrot.lane.b32.xlu0 %v2573_v33, %s2373_s6 }
 0x43f   :  { %2276 = vpow2.f32 %v528_v26 }
 0x442   :  { %548 = vadd.xlane.f32.xlu2 %v547_v29 }
 0x445   :  { %v2277_v30 = vpop.eup %2276 }
 0x446   :  { %719 = vrot.lane.b32.xlu0 %v2602_v2, %s2373_s6  ;;  %v544_v31 = vsel %vm308_vm12, %v2277_v30, 0.0 }
 0x447   :  { %545 = vadd.xlane.f32.xlu1 %v544_v31 }
 0x44f   :  { %515 = vmax.xlane.f32.xlu1 %v514_v34 }
 0x45a   :  { %592 = vrot.lane.b32.xlu2 %v2581_v39, %s2373_s6 }
 0x468   :  { %656 = vrot.lane.b32.xlu1 %v2592_v56, %s2373_s6 }
 0x495   :  { %v504_v33 = vpop.xlane.xlu2 %503 }
 0x496   :  { %v522_v35 = vsub.f32 %v373_v59, %v504_v33 }
 0x498   :  { %v532_v36 = vmul.f32 1.442695, %v522_v35 }
 0x49a   :  { %2278 = vpow2.f32 %v532_v36 }
 0x49b   :  { %v507_v2 = vpop.xlane.xlu1 %506 }
 0x49c   :  { %v523_v37 = vsub.f32 %v397_v62, %v507_v2 }
 0x49d   :  { %v510_v38 = vpop.xlane.xlu0 %509 }
 0x49e   :  { %v534_v40 = vmul.f32 1.442695, %v523_v37  ;;  %v524_v41 = vsub.f32 %v421_v3, %v510_v38 }
 0x4a0   :  { %v2663_v42 = vpop.eup %2278  ;;  %2280 = vpow2.f32 %v534_v40  ;;  %v536_v43 = vmul.f32 1.442695, %v524_v41 }
 0x4a1   :  { %v550_v44 = vsel %vm308_vm12, %v2663_v42, 0.0 }
 0x4a2   :  { %2282 = vpow2.f32 %v536_v43  ;;  %551 = vadd.xlane.f32.xlu2 %v550_v44 }
 0x4a6   :  { %v2667_v39 = vpop.eup %2280 }
 0x4a7   :  { %v553_v56 = vsel %vm308_vm12, %v2667_v39, 0.0 }
 0x4a8   :  { %v2671_v45 = vpop.eup %2282  ;;  %554 = vadd.xlane.f32.xlu0 %v553_v56 }
 0x4a9   :  { %v556_v46 = vsel %vm308_vm12, %v2671_v45, 0.0 }
 0x4aa   :  { %557 = vadd.xlane.f32.xlu2 %v556_v46 }
 0x4ad   :  { %v519_v47 = vpop.xlane.xlu2 %518  ;;  %v513_v49 = vpop.xlane.xlu1 %512 }
 0x4ae   :  { %v527_v51 = vsub.f32 %v493_v16, %v519_v47  ;;  %v525_v53 = vsub.f32 %v445_v15, %v513_v49 }
 0x4b0   :  { %v542_v54 = vmul.f32 1.442695, %v527_v51  ;;  %v538_v55 = vmul.f32 1.442695, %v525_v53  ;;  %v615_v57 = vpop.permute.xlu0 %614 }
 0x4b1   :  { %v620_v58 = vsel %vm597_vm13, %v615_v57, 0 }
 0x4b2   :  { %2284 = vpow2.f32 %v542_v54  ;;  %629 = vmatpush.bf16.msrb.mxu1 %v620_v58 }
 0x4b3   :  { %2286 = vpow2.f32 %v538_v55 }
 0x4b5   :  { %v549_v59 = vpop.xlane.xlu2 %548 }
 0x4b6   :  { %2288 = vrcp.f32 %v549_v59 }
 0x4b8   :  { %v2285_v60 = vpop.eup %2284  ;;  %v720_v61 = vpop.permute.xlu0 %719 }
 0x4b9   :  { %v2287_v62 = vpop.eup %2286  ;;  %v725_v0 = vsel %vm597_vm13, %v720_v61, 0  ;;  %v565_v1 = vsel %vm308_vm12, %v2285_v60, 0.0 }
 0x4ba   :  { %566 = vadd.xlane.f32.xlu0 %v565_v1  ;;  %v559_v3 = vsel %vm308_vm12, %v2287_v62, 0.0  ;;  %v546_v4 = vpop.xlane.xlu1 %545  ;;  %734 = vmatpush.bf16.msra.mxu2 %v725_v0 }
 0x4bb   :  { %560 = vadd.xlane.f32.xlu1 %v559_v3  ;;  %2290 = vrcp.f32 %v546_v4 }
 0x4bc   :  { %v2289_v5 = vpop.eup %2288 }
 0x4bd   :  { %v577_v6 = vmul.f32 %v2289_v5, %v2275_v25  ;;  %v593_v8 = vpop.permute.xlu2 %592 }
 0x4be   :  { %v599_v9 = vsel %vm597_vm13, %v593_v8, 0 }
 0x4bf   :  { %v585_v10 = vpack.c.bf16 %v577_v6, %v577_v6  ;;  %608 = vmatpush.bf16.msrb.mxu0 %v599_v9 }
 0x4c1   :  { %v2291_v11 = vpop.eup %2290  ;;  %2005 = vmatmul.msk.bf16.vlgmr.msrb.gmra.mxu1 %vm308_vm12, %v585_v10 }
 0x4c2   :  { %v576_v12 = vmul.f32 %v2291_v11, %v2277_v30  ;;  %v516_v13 = vpop.xlane.xlu1 %515  ;;  %740 = vrot.lane.b32.xlu2 %v2597_v63, %s2373_s6  ;;  %v2147_v11 = vld [vmem:[%s3023_s9 + $0x8] sm:$0xff] }
 0x4c3   :  { %v526_v14 = vsub.f32 %v2655_v32, %v516_v13 }
 0x4c4   :  { %v584_v15 = vpack.c.bf16 %v576_v12, %v576_v12  ;;  %v2146_v12 = vld [vmem:[%s3023_s9] sm:$0xff] }
 0x4c5   :  { %v540_v16 = vmul.f32 1.442695, %v526_v14 }
 0x4c6   :  { %2004 = vmatmul.msk.bf16.vlgmr.msrb.gmra.mxu0 %vm308_vm12, %v584_v15 }
 0x4c7   :  { %2292 = vpow2.f32 %v540_v16 }
 0x4cd   :  { %v2293_v18 = vpop.eup %2292 }
 0x4ce   :  { %698 = vrot.lane.b32.xlu0 %v2608_v7, %s2373_s6  ;;  %v562_v19 = vsel %vm308_vm12, %v2293_v18, 0.0 }
 0x4cf   :  { %563 = vadd.xlane.f32.xlu1 %v562_v19 }
 0x4da   :  { %v657_v20 = vpop.permute.xlu1 %656 }
 0x4db   :  { %v662_v21 = vsel %vm597_vm13, %v657_v20, 0 }
 0x4dc   :  { %671 = vmatpush.bf16.msrb.mxu3 %v662_v21 }
 0x4e8   :  { %677 = vrot.lane.b32.xlu1 %v2588_v50, %s2373_s6 }
 0x515   :  { %v552_v63 = vpop.xlane.xlu2 %551 }
 0x516   :  { %2294 = vrcp.f32 %v552_v63 }
 0x51b   :  { %v555_v22 = vpop.xlane.xlu0 %554 }
 0x51c   :  { %v2295_v26 = vpop.eup %2294  ;;  %2296 = vrcp.f32 %v555_v22 }
 0x51d   :  { %v578_v25 = vmul.f32 %v2295_v26, %v2663_v42  ;;  %v558_v27 = vpop.xlane.xlu2 %557 }
 0x51f   :  { %v586_v28 = vpack.c.bf16 %v578_v25, %v578_v25 }
 0x521   :  { %2006 = vmatmul.msk.bf16.vlgmr.msrb.gmra.mxu2 %vm308_vm12, %v586_v28 }
 0x522   :  { %v2297_v7 = vpop.eup %2296 }
 0x523   :  { %v579_v29 = vmul.f32 %v2297_v7, %v2667_v39 }
 0x525   :  { %v587_v30 = vpack.c.bf16 %v579_v29, %v579_v29  ;;  %v741_v31 = vpop.permute.xlu2 %740 }
 0x526   :  { %v746_v32 = vsel %vm597_vm13, %v741_v31, 0 }
 0x527   :  { %2007 = vmatmul.msk.bf16.vlgmr.msrb.gmra.mxu3 %vm308_vm12, %v587_v30  ;;  %v2252_v30 = vld [vmem:[%s3022_s10] ss:$0 sm:$0xff] }
 0x528   :  { %755 = vmatpush.bf16.msra.mxu3 %v746_v32 }
 0x52d   :  { %v567_v50 = vpop.xlane.xlu0 %566 }
 0x52e   :  { %2298 = vrcp.f32 %v567_v50  ;;  %v561_v34 = vpop.xlane.xlu1 %560 }
 0x52f   :  { %2300 = vrcp.f32 %v561_v34 }
 0x534   :  { %v2299_v33 = vpop.eup %2298 }
 0x535   :  { %v583_v35 = vmul.f32 %v2299_v33, %v2285_v60  ;;  %v2301_v2 = vpop.eup %2300 }
 0x536   :  { %v581_v38 = vmul.f32 %v2301_v2, %v2287_v62 }
 0x537   :  { %v591_v36 = vpack.c.bf16 %v583_v35, %v583_v35 }
 0x538   :  { %v589_v43 = vpack.c.bf16 %v581_v38, %v581_v38 }
 0x539   :  { %2011 = vmatmul.msk.bf16.vlgmr.msra.gmra.mxu3 %vm308_vm12, %v591_v36 }
 0x53e   :  { %v631_v37 = vpop.f32.mrf.mxu1 }
 0x540   :  { %v699_v40 = vpop.permute.xlu0 %698 }
 0x541   :  { %v704_v41 = vsel %vm597_vm13, %v699_v40, 0 }
 0x542   :  { %v564_v42 = vpop.xlane.xlu1 %563  ;;  %713 = vmatpush.bf16.msra.mxu1 %v704_v41 }
 0x543   :  { %2302 = vrcp.f32 %v564_v42  ;;  %v610_v44 = vpop.f32.mrf.mxu0 }
 0x544   :  { %2304 = vrcp.f32 %v558_v27 }
 0x545   :  { %2009 = vmatmul.msk.bf16.vlgmr.msra.gmra.mxu1 %vm308_vm12, %v589_v43 }
 0x546   :  { %v633_v39 = vpop.f32.mrf.mxu1 }
 0x549   :  { %v2303_v56 = vpop.eup %2302 }
 0x54a   :  { %v582_v46 = vmul.f32 %v2303_v56, %v2293_v18  ;;  %v2305_v51 = vpop.eup %2304 }
 0x54b   :  { %v612_v47 = vpop.f32.mrf.mxu0  ;;  %v580_v53 = vmul.f32 %v2305_v51, %v2671_v45  ;;  %v2148_v51 = vld [vmem:[%s3027_s13] sm:$0xff] }
 0x54c   :  { %v590_v49 = vpack.c.bf16 %v582_v46, %v582_v46 }
 0x54d   :  { %v588_v57 = vpack.c.bf16 %v580_v53, %v580_v53 }
 0x54e   :  { %2010 = vmatmul.msk.bf16.vlgmr.msra.gmra.mxu2 %vm308_vm12, %v590_v49 }
 0x55a   :  { %v678_v54 = vpop.permute.xlu1 %677 }
 0x55b   :  { %v683_v55 = vsel %vm597_vm13, %v678_v54, 0 }
 0x55c   :  { %692 = vmatpush.bf16.msra.mxu0 %v683_v55 }
 0x55f   :  { %2008 = vmatmul.msk.bf16.vlgmr.msra.gmra.mxu0 %vm308_vm12, %v588_v57 }
 0x560   :  { %823 = vmatpush.bf16.msrb.mxu0 %v2147_v11  ;;  %v2254_v11 = vld [vmem:[%s3025_s12] ss:$0 sm:$0xff] }
 0x564   :  { %824 = vmatpush.bf16.msrb.mxu0 %v2146_v12 }
 0x5a4   :  { %v652_v58 = vpop.f32.mrf.mxu2 }
 0x5aa   :  { %v673_v59 = vpop.f32.mrf.mxu3 }
 0x5ab   :  { %v2188_v60 = vpack.i.bf16 %v673_v59, %v652_v58 }
 0x5ac   :  { %v654_v61 = vpop.f32.mrf.mxu2 }
 0x5ad   :  { %2189 = vrot.lane.b32.xlu2 %v2188_v60, %s2374_s1 }
 0x5b2   :  { %v675_v62 = vpop.f32.mrf.mxu3 }
 0x5bc   :  { %v757_v0 = vpop.f32.mrf.mxu3 }
 0x5c2   :  { %v715_v1 = vpop.f32.mrf.mxu1 }
 0x5c4   :  { %v759_v3 = vpop.f32.mrf.mxu3 }
 0x5ca   :  { %v717_v4 = vpop.f32.mrf.mxu1 }
 0x5d1   :  { %v736_v45 = vpop.f32.mrf.mxu2 }
 0x5d2   :  { %v2198_v5 = vpack.i.bf16 %v757_v0, %v736_v45 }
 0x5d4   :  { %2199 = vrot.lane.b32.xlu1 %v2198_v5, %s3037_s2 }
 0x5d9   :  { %v738_v6 = vpop.f32.mrf.mxu2 }
 0x5da   :  { %v2253_v6 = vld [vmem:[%s3024_s11] ss:$0 sm:$0xff] }
 0x5dc   :  { %v694_v8 = vpop.f32.mrf.mxu0 }
 0x5dd   :  { %v2193_v9 = vpack.i.bf16 %v715_v1, %v694_v8 }
 0x5df   :  { %2194 = vrot.lane.b32.xlu0 %v2193_v9, %s3038_s24 }
 0x5e4   :  { %v696_v10 = vpop.f32.mrf.mxu0 }
 0x607   :  { %v2190_v13 = vpop.permute.xlu2 %2189 }
 0x608   :  { %v2192_v14 = vunpack.i.h.bf16 %v2190_v13  ;;  %v2191_v15 = vunpack.i.l.bf16 %v2190_v13 }
 0x60a   :  { %v786_v21 = vsel %vm308_vm12, %v631_v37, %v2192_v14  ;;  %v785_v63 = vsel %vm308_vm12, %v610_v44, %v2191_v15 }
 0x646   :  { %v2200_v16 = vpop.permute.xlu1 %2199 }
 0x647   :  { %v2202_v22 = vunpack.i.h.bf16 %v2200_v16  ;;  %v2201_v26 = vunpack.i.l.bf16 %v2200_v16 }
 0x651   :  { %v2195_v18 = vpop.permute.xlu0 %2194 }
 0x652   :  { %v2197_v19 = vunpack.i.h.bf16 %v2195_v18  ;;  %v2196_v20 = vunpack.i.l.bf16 %v2195_v18 }
 0x654   :  { %v789_v25 = vsel %vm787_vm14, %v786_v21, %v2197_v19  ;;  %v788_v27 = vsel %vm787_vm14, %v785_v63, %v2196_v20  ;;  %v2153_v19 = vld [vmem:[%s3029_s15 + $0x18] sm:$0xff]  ;;  %v2152_v20 = vld [vmem:[%s3029_s15 + $0x10] sm:$0xff]  ;;  %v2151_v21 = vld [vmem:[%s3029_s15 + $0x8] sm:$0xff] }
 0x655   :  { %v792_v28 = vsel %vm790_vm15, %v789_v25, %v2202_v22  ;;  %v791_v7 = vsel %vm790_vm15, %v788_v27, %v2201_v26  ;;  %990 = vmatpush.bf16.msrb.mxu2 %v2153_v19  ;;  %v2150_v63 = vld [vmem:[%s3029_s15] sm:$0xff] }
 0x656   :  { %v793_v29 = vpack.c.bf16 %v792_v28, %v791_v7  ;;  %v2255_v22 = vld [vmem:[%s3026_s14] ss:$0 sm:$0xff] }
 0x658   :  { %2020 = vmatmul.msk.bf16.vlgmr.msrb.gmra.mxu0 %vm135_vm4, %v793_v29 }
 0x659   :  { %991 = vmatpush.bf16.msrb.mxu2 %v2152_v20 }
 0x65d   :  { %992 = vmatpush.bf16.msrb.mxu2 %v2151_v21 }
 0x661   :  { %993 = vmatpush.bf16.msrb.mxu2 %v2150_v63 }
 0x6d5   :  { %v826_v31 = vpop.f32.mrf.mxu0 }
 0x6d6   :  { %v827_v32 = vadd.f32 %v2252_v30, %v826_v31 }
 0x6d8   :  { %v831_v50 = vadd.f32 %v827_v32, %v2560_v23 }
 0x6da   :  { %v835_v34 = vsel %vm135_vm4, %v831_v50, 0.0 }
 0x6db   :  { %836 = vadd.xlane.f32.xlu2 %v835_v34 }
 0x6dd   :  { %v828_v33 = vpop.f32.mrf.mxu0 }
 0x6de   :  { %v829_v35 = vadd.f32 %v2252_v30, %v828_v33 }
 0x6e0   :  { %v832_v36 = vadd.f32 %v829_v35, %v2562_v24  ;;  %v2149_v24 = vld [vmem:[%s3027_s13 + $0x8] sm:$0xff] }
 0x6e1   :  { %919 = vmatpush.bf16.msrb.mxu1 %v2149_v24 }
 0x6e2   :  { %v838_v2 = vsel %vm135_vm4, %v832_v36, 0.0 }
 0x6e3   :  { %839 = vadd.xlane.f32.xlu0 %v838_v2 }
 0x6e5   :  { %920 = vmatpush.bf16.msrb.mxu1 %v2148_v51 }
 0x74e   :  { %v837_v37 = vpop.xlane.xlu2 %836 }
 0x74f   :  { %v841_v38 = vmul.f32 %v837_v37, %v2540_v48 }
 0x751   :  { %v843_v40 = vsub.f32 %v831_v50, %v841_v38 }
 0x753   :  { %v845_v41 = vmul.f32 %v843_v40, %v843_v40 }
 0x755   :  { %v847_v42 = vsel %vm135_vm4, %v845_v41, 0.0 }
 0x756   :  { %v840_v43 = vpop.xlane.xlu0 %839  ;;  %848 = vadd.xlane.f32.xlu1 %v847_v42 }
 0x757   :  { %v842_v23 = vmul.f32 %v840_v43, %v2540_v48 }
 0x759   :  { %v844_v44 = vsub.f32 %v832_v36, %v842_v23 }
 0x75b   :  { %v846_v39 = vmul.f32 %v844_v44, %v844_v44 }
 0x75d   :  { %v850_v56 = vsel %vm135_vm4, %v846_v39, 0.0  ;;  %v2256_v39 = vld [vmem:[%s3028_s16] ss:$0 sm:$0xff] }
 0x75e   :  { %851 = vadd.xlane.f32.xlu2 %v850_v56 }
 0x7c9   :  { %v849_v46 = vpop.xlane.xlu1 %848 }
 0x7ca   :  { %v853_v47 = vmul.f32 %v849_v46, %v2540_v48 }
 0x7cc   :  { %v855_v49 = vadd.f32 1e-12, %v853_v47 }
 0x7ce   :  { %2306 = vrsqrt.f32 %v855_v49  ;;  %vm863_vm1 = vweird.f32 %v855_v49 }
 0x7d1   :  { %v852_v53 = vpop.xlane.xlu2 %851 }
 0x7d2   :  { %v854_v54 = vmul.f32 %v852_v53, %v2540_v48 }
 0x7d4   :  { %v2307_v55 = vpop.eup %2306  ;;  %v856_v57 = vadd.f32 1e-12, %v854_v54 }
 0x7d5   :  { %v858_v58 = vmul.f32 %v2307_v55, %v855_v49  ;;  %vm864_vm0 = vweird.f32 %v2307_v55 }
 0x7d6   :  { %2308 = vrsqrt.f32 %v856_v57  ;;  %vm865_vm2 = vmor %vm863_vm1, %vm864_vm0  ;;  %vm873_vm5 = vweird.f32 %v856_v57 }
 0x7d7   :  { %v859_v59 = vmul.f32 %v2307_v55, %v858_v58 }
 0x7d9   :  { %v860_v60 = vmul.f32 0.5, %v859_v59 }
 0x7db   :  { %v861_v61 = vsub.f32 1.5, %v860_v60 }
 0x7dc   :  { %v2309_v62 = vpop.eup %2308 }
 0x7dd   :  { %v862_v0 = vmul.f32 %v2307_v55, %v861_v61  ;;  %v868_v1 = vmul.f32 %v2309_v62, %v856_v57  ;;  %vm874_vm3 = vweird.f32 %v2309_v62 }
 0x7de   :  { %vm875_vm6 = vmor %vm873_vm5, %vm874_vm3 }
 0x7df   :  { %v869_v3 = vmul.f32 %v2309_v62, %v868_v1  ;;  %v866_v4 = vsel %vm865_vm2, %v2307_v55, %v862_v0 }
 0x7e0   :  { %v877_v8 = vmul.f32 %v866_v4, %v843_v40  ;;  %v2155_v4 = vld [vmem:[%s3020_s7 + $0x18] sm:$0xff] }
 0x7e1   :  { %v870_v45 = vmul.f32 0.5, %v869_v3  ;;  %1090 = vmatpush.bf16.msrb.mxu3 %v2155_v4 }
 0x7e2   :  { %v882_v12 = vmul.f32 %v2253_v6, %v877_v8  ;;  %v2154_v8 = vld [vmem:[%s3020_s7 + $0x10] sm:$0xff] }
 0x7e3   :  { %v871_v5 = vsub.f32 1.5, %v870_v45 }
 0x7e4   :  { %v887_v15 = vadd.f32 %v2254_v11, %v882_v12 }
 0x7e5   :  { %v872_v9 = vmul.f32 %v2309_v62, %v871_v5  ;;  %1091 = vmatpush.bf16.msrb.mxu3 %v2154_v8 }
 0x7e7   :  { %v876_v10 = vsel %vm875_vm6, %v2309_v62, %v872_v9 }
 0x7e8   :  { %v878_v13 = vmul.f32 %v876_v10, %v844_v44 }
 0x7ea   :  { %v883_v14 = vmul.f32 %v2253_v6, %v878_v13 }
 0x7ec   :  { %v888_v16 = vadd.f32 %v2254_v11, %v883_v14 }
 0x7ee   :  { %v889_v18 = vpack.c.bf16 %v888_v16, %v887_v15 }
 0x7f0   :  { %2029 = vmatmul.msk.bf16.vlgmr.msrb.gmra.mxu1 %vm135_vm4, %v889_v18 }
 0x86d   :  { %v922_v26 = vpop.f32.mrf.mxu1 }
 0x86e   :  { %v923_v25 = vadd.f32 %v2255_v22, %v922_v26 }
 0x870   :  { %v929_v27 = vmul.f32 0.044715, %v923_v25  ;;  %v927_v40 = vmul.f32 0.5, %v923_v25 }
 0x872   :  { %v931_v28 = vmul.f32 %v929_v27, %v923_v25 }
 0x874   :  { %v933_v7 = vmul.f32 %v931_v28, %v923_v25 }
 0x875   :  { %v924_v29 = vpop.f32.mrf.mxu1 }
 0x876   :  { %v935_v30 = vadd.f32 %v933_v7, %v923_v25  ;;  %v925_v31 = vadd.f32 %v2255_v22, %v924_v29  ;;  %v2257_v25 = vld [vmem:[%s3030_s17] ss:$0 sm:$0xff] }
 0x877   :  { %v2258_v29 = vld [vmem:[%s3031_s18] ss:$0 sm:$0xff] }
 0x878   :  { %v930_v32 = vmul.f32 0.044715, %v925_v31  ;;  %v937_v50 = vmul.f32 0.7978846, %v935_v30  ;;  %v928_v41 = vmul.f32 0.5, %v925_v31 }
 0x87a   :  { %v932_v34 = vmul.f32 %v930_v32, %v925_v31  ;;  %2310 = vtanh.f32 %v937_v50 }
 0x87c   :  { %v934_v33 = vmul.f32 %v932_v34, %v925_v31 }
 0x87e   :  { %v936_v35 = vadd.f32 %v934_v33, %v925_v31 }
 0x880   :  { %v938_v36 = vmul.f32 0.7978846, %v936_v35  ;;  %v2311_v2 = vpop.eup %2310 }
 0x881   :  { %v941_v37 = vadd.f32 1.0, %v2311_v2 }
 0x882   :  { %2312 = vtanh.f32 %v938_v36  ;;  %v2259_v36 = vld [vmem:[%s3019_s8 + $0x1] ss:$0 sm:$0xff]  ;;  %s3051_s8 = smov 16  }
 0x883   :  { %v943_v43 = vmul.f32 %v941_v37, %v927_v40 }
 0x888   :  { %v2313_v38 = vpop.eup %2312 }
 0x889   :  { %v942_v42 = vadd.f32 1.0, %v2313_v38 }
 0x88b   :  { %v944_v23 = vmul.f32 %v942_v42, %v928_v41 }
 0x88d   :  { %v945_v44 = vpack.c.bf16 %v944_v23, %v943_v43 }
 0x88f   :  { %2046 = vmatmul.msk.bf16.vlgmr.msrb.gmra.mxu2 %vm982_vm7, %v945_v44 }
 0x912   :  { %v995_v56 = vpop.f32.mrf.mxu2 }
 0x913   :  { %v996_v24 = vadd.f32 %v2256_v39, %v995_v56 }
 0x915   :  { %v1000_v46 = vadd.f32 %v996_v24, %v887_v15 }
 0x917   :  { %v1004_v47 = vsel %vm135_vm4, %v1000_v46, 0.0 }
 0x918   :  { %1005 = vadd.xlane.f32.xlu0 %v1004_v47 }
 0x91a   :  { %v997_v49 = vpop.f32.mrf.mxu2 }
 0x91b   :  { %v998_v51 = vadd.f32 %v2256_v39, %v997_v49 }
 0x91d   :  { %v1001_v53 = vadd.f32 %v998_v51, %v888_v16 }
 0x91f   :  { %v1007_v54 = vsel %vm135_vm4, %v1001_v53, 0.0 }
 0x920   :  { %1008 = vadd.xlane.f32.xlu1 %v1007_v54 }
 0x98b   :  { %v1006_v55 = vpop.xlane.xlu0 %1005 }
 0x98c   :  { %v1010_v57 = vmul.f32 %v1006_v55, %v2540_v48 }
 0x98e   :  { %v1012_v58 = vsub.f32 %v1000_v46, %v1010_v57 }
 0x990   :  { %v1014_v59 = vmul.f32 %v1012_v58, %v1012_v58 }
 0x992   :  { %v1016_v60 = vsel %vm135_vm4, %v1014_v59, 0.0 }
 0x993   :  { %v1009_v61 = vpop.xlane.xlu1 %1008  ;;  %1017 = vadd.xlane.f32.xlu2 %v1016_v60 }
 0x994   :  { %v1011_v62 = vmul.f32 %v1009_v61, %v2540_v48 }
 0x996   :  { %v1013_v0 = vsub.f32 %v1001_v53, %v1011_v62 }
 0x998   :  { %v1015_v1 = vmul.f32 %v1013_v0, %v1013_v0 }
 0x99a   :  { %v1019_v3 = vsel %vm135_vm4, %v1015_v1, 0.0 }
 0x99b   :  { %1020 = vadd.xlane.f32.xlu0 %v1019_v3 }
 0xa06   :  { %v1018_v45 = vpop.xlane.xlu2 %1017 }
 0xa07   :  { %v1022_v5 = vmul.f32 %v1018_v45, %v2540_v48 }
 0xa09   :  { %v1024_v6 = vadd.f32 1e-12, %v1022_v5 }
 0xa0b   :  { %2314 = vrsqrt.f32 %v1024_v6  ;;  %vm1032_vm9 = vweird.f32 %v1024_v6 }
 0xa0e   :  { %v1021_v9 = vpop.xlane.xlu0 %1020 }
 0xa0f   :  { %v1023_v10 = vmul.f32 %v1021_v9, %v2540_v48 }
 0xa11   :  { %v2315_v11 = vpop.eup %2314  ;;  %v1025_v12 = vadd.f32 1e-12, %v1023_v10 }
 0xa12   :  { %v1027_v13 = vmul.f32 %v2315_v11, %v1024_v6  ;;  %vm1033_vm8 = vweird.f32 %v2315_v11 }
 0xa13   :  { %2316 = vrsqrt.f32 %v1025_v12  ;;  %vm1034_vm10 = vmor %vm1032_vm9, %vm1033_vm8  ;;  %vm1042_vm0 = vweird.f32 %v1025_v12 }
 0xa14   :  { %v1028_v14 = vmul.f32 %v2315_v11, %v1027_v13 }
 0xa16   :  { %v1029_v15 = vmul.f32 0.5, %v1028_v14 }
 0xa18   :  { %v1030_v16 = vsub.f32 1.5, %v1029_v15 }
 0xa19   :  { %v2317_v18 = vpop.eup %2316 }
 0xa1a   :  { %v1031_v19 = vmul.f32 %v2315_v11, %v1030_v16  ;;  %v1037_v20 = vmul.f32 %v2317_v18, %v1025_v12  ;;  %vm1043_vm11 = vweird.f32 %v2317_v18 }
 0xa1b   :  { %vm1044_vm1 = vmor %vm1042_vm0, %vm1043_vm11  ;;  %vm1931_vm11 = vcmask 1041409  }
 0xa1c   :  { %v1038_v21 = vmul.f32 %v2317_v18, %v1037_v20  ;;  %v1035_v63 = vsel %vm1034_vm10, %v2315_v11, %v1031_v19 }
 0xa1d   :  { %v1046_v27 = vmul.f32 %v1035_v63, %v1012_v58 }
 0xa1e   :  { %v1039_v22 = vmul.f32 0.5, %v1038_v21 }
 0xa1f   :  { %v1051_v30 = vmul.f32 %v2257_v25, %v1046_v27 }
 0xa20   :  { %v1040_v26 = vsub.f32 1.5, %v1039_v22 }
 0xa21   :  { %v2784_v50 = vadd.f32 %v2258_v29, %v1051_v30 }
 0xa22   :  { %v1041_v28 = vmul.f32 %v2317_v18, %v1040_v26 }
 0xa24   :  { %v1045_v7 = vsel %vm1044_vm1, %v2317_v18, %v1041_v28 }
 0xa25   :  { %v1047_v31 = vmul.f32 %v1045_v7, %v1013_v0 }
 0xa27   :  { %v1052_v32 = vmul.f32 %v2257_v25, %v1047_v31 }
 0xa29   :  { %v2786_v34 = vadd.f32 %v2258_v29, %v1052_v32 }
 0xa2b   :  { %v1058_v33 = vpack.c.bf16 %v2786_v34, %v2784_v50 }
 0xa2d   :  { %2060 = vmatmul.msk.bf16.vlgmr.msrb.gmra.mxu3 %vm135_vm4, %v1058_v33 }
 0xab0   :  { %v1093_v35 = vpop.f32.mrf.mxu3 }
 0xab1   :  { %v1094_v2 = vadd.f32 %v2259_v36, %v1093_v35 }
 0xab3   :  { %v2794_v40 = vmul.f32 0.35355338, %v1094_v2  ;;  %v1148_v3 = vpack.c.bf16 %v1094_v2, %v1094_v2 }
 0xab5   :  { %v1157_v5 = vunpack.c.l.b16 %v1148_v3 }
 0xab7   :  { %v2819_v9 = vpack.c.b16 %v1157_v5, %v1157_v5 }
 0xab8   :  { %v1095_v37 = vpop.f32.mrf.mxu3 }
 0xab9   :  { %v1096_v38 = vadd.f32 %v2259_v36, %v1095_v37 }
 0xabb   :  { %v2213_v41 = vpack.i.bf16 %v1096_v38, %v1094_v2  ;;  %v2796_v42 = vmul.f32 0.35355338, %v1096_v38  ;;  %v1149_v1 = vpack.c.bf16 %v1096_v38, %v1096_v38  ;;  %v1120_v2 = vpack.c.bf16 %v2794_v40, %v2794_v40 }
 0xabd   :  { %2214 = vrot.lane.b32.xlu0 %v2213_v41, %s2370_s28  ;;  %2209 = vrot.lane.b32.xlu2 %v2213_v41, %s2372_s26  ;;  %v2223_v43 = vpack.i.bf16 %v2796_v42, %v2794_v40  ;;  %v1181_v45 = vunpack.c.l.b16 %v1149_v1  ;;  %v1121_v37 = vpack.c.bf16 %v2796_v42, %v2796_v42 }
 0xabe   :  { %2204 = vrot.lane.b32.xlu1 %v2213_v41, %s2369_s5 }
 0xabf   :  { %v2817_v8 = vpack.c.b16 %v1181_v45, %v1181_v45 }
 0xac5   :  { %2219 = vrot.lane.b32.xlu2 %v2223_v43, %s2369_s5  ;;  %s3052_s5 = smov 24  }
 0xb17   :  { %v2210_v23 = vpop.permute.xlu2 %2209 }
 0xb18   :  { %v2211_v44 = vunpack.i.l.bf16 %v2210_v23  ;;  %v2212_v4 = vunpack.i.h.bf16 %v2210_v23 }
 0xb1a   :  { %v1154_v39 = vpack.c.bf16 %v2211_v44, %v2211_v44  ;;  %v1155_v6 = vpack.c.bf16 %v2212_v4, %v2212_v4 }
 0xb1c   :  { %v1301_v56 = vunpack.c.l.b16 %v1154_v39  ;;  %v1325_v10 = vunpack.c.l.b16 %v1155_v6 }
 0xb1e   :  { %v2804_v24 = vpack.c.b16 %v1301_v56, %v1301_v56  ;;  %v2826_v12 = vpack.c.b16 %v1325_v10, %v1325_v10 }
 0xb1f   :  { %v2220_v16 = vpop.permute.xlu2 %2219 }
 0xb20   :  { %1303 = vrot.lane.b32.xlu2 %v2804_v24, %s2371_s30  ;;  %v2222_v25 = vunpack.i.h.bf16 %v2220_v16  ;;  %v2221_v27 = vunpack.i.l.bf16 %v2220_v16 }
 0xb22   :  { %v1123_v28 = vpack.c.bf16 %v2222_v25, %v2222_v25  ;;  %v1122_v7 = vpack.c.bf16 %v2221_v27, %v2221_v27 }
 0xb2f   :  { %v2215_v46 = vpop.permute.xlu0 %2214 }
 0xb30   :  { %v2216_v47 = vunpack.i.l.bf16 %v2215_v46  ;;  %v2205_v49 = vpop.permute.xlu1 %2204  ;;  %v2217_v11 = vunpack.i.h.bf16 %v2215_v46 }
 0xb31   :  { %v2207_v51 = vunpack.i.h.bf16 %v2205_v49  ;;  %v2206_v53 = vunpack.i.l.bf16 %v2205_v49 }
 0xb32   :  { %v1152_v54 = vpack.c.bf16 %v2216_v47, %v2216_v47  ;;  %v1153_v13 = vpack.c.bf16 %v2217_v11, %v2217_v11 }
 0xb33   :  { %v1151_v55 = vpack.c.bf16 %v2207_v51, %v2207_v51  ;;  %v1150_v57 = vpack.c.bf16 %v2206_v53, %v2206_v53 }
 0xb34   :  { %v1253_v58 = vunpack.c.l.b16 %v1152_v54  ;;  %v1277_v14 = vunpack.c.l.b16 %v1153_v13 }
 0xb35   :  { %v1229_v59 = vunpack.c.l.b16 %v1151_v55  ;;  %v1205_v60 = vunpack.c.l.b16 %v1150_v57 }
 0xb36   :  { %v2808_v61 = vpack.c.b16 %v1253_v58, %v1253_v58  ;;  %v2831_v15 = vpack.c.b16 %v1277_v14, %v1277_v14 }
 0xb37   :  { %v2810_v62 = vpack.c.b16 %v1229_v59, %v1229_v59  ;;  %v1206_v0 = vpack.c.b16 %v1205_v60, %v1205_v60 }
 0xb38   :  { %1255 = vrot.lane.b32.xlu2 %v2808_v61, %s2371_s30 }
 0xb39   :  { %1231 = vrot.lane.b32.xlu1 %v2810_v62, %s2371_s30  ;;  %1207 = vrot.lane.b32.xlu0 %v1206_v0, %s2371_s30 }
 0xb40   :  { %1486 = vrot.lane.b32.xlu2 %v1206_v0, %s2373_s6 }
 0xb41   :  { %1183 = vrot.lane.b32.xlu1 %v2817_v8, %s2371_s30  ;;  %1159 = vrot.lane.b32.xlu0 %v2819_v9, %s2371_s30 }
 0xb49   :  { %1327 = vrot.lane.b32.xlu0 %v2826_v12, %s2371_s30  ;;  %2224 = vrot.lane.b32.xlu1 %v2223_v43, %s2372_s26 }
 0xb51   :  { %1279 = vrot.lane.b32.xlu0 %v2831_v15, %s2371_s30  ;;  %2229 = vrot.lane.b32.xlu1 %v2223_v43, %s2370_s28 }
 0xb7a   :  { %v1304_v18 = vpop.permute.xlu2 %1303 }
 0xb7b   :  { %v1309_v26 = vsel %vm308_vm12, %v1304_v18, 0 }
 0xb92   :  { %v1256_v19 = vpop.permute.xlu2 %1255 }
 0xb93   :  { %v1261_v35 = vsel %vm308_vm12, %v1256_v19, 0 }
 0xb9a   :  { %v1487_v29 = vpop.permute.xlu2 %1486 }
 0xb9b   :  { %v1492_v36 = vsel %vm597_vm13, %v1487_v29, 0 }
 0xbab   :  { %v1232_v20 = vpop.permute.xlu1 %1231  ;;  %v1208_v21 = vpop.permute.xlu0 %1207 }
 0xbac   :  { %v1237_v63 = vsel %vm308_vm12, %v1232_v20, 0  ;;  %v1213_v22 = vsel %vm308_vm12, %v1208_v21, 0 }
 0xbad   :  { %1222 = vmatpush.bf16.xpose.msra.mxu2 %v1213_v22  ;;  %1246 = vmatpush.bf16.xpose.msra.mxu3 %v1237_v63 }
 0xbb3   :  { %v1184_v30 = vpop.permute.xlu1 %1183  ;;  %v1160_v31 = vpop.permute.xlu0 %1159 }
 0xbb4   :  { %v1189_v32 = vsel %vm308_vm12, %v1184_v30, 0  ;;  %v1165_v33 = vsel %vm308_vm12, %v1160_v31, 0  ;;  %2063 = vmatmul.msk.bf16.vlgmr.msra.gmra.mxu2 %vm308_vm12, %v1122_v7  ;;  %2064 = vmatmul.msk.bf16.vlgmr.msra.gmra.mxu3 %vm308_vm12, %v1123_v28 }
 0xbb5   :  { %1318 = vmatpush.bf16.xpose.msrb.mxu2 %v1309_v26  ;;  %1174 = vmatpush.bf16.xpose.msra.mxu0 %v1165_v33 }
 0xbb6   :  { %1198 = vmatpush.bf16.xpose.msra.mxu1 %v1189_v32 }
 0xbbb   :  { %v1328_v38 = vpop.permute.xlu0 %1327  ;;  %v2225_v41 = vpop.permute.xlu1 %2224 }
 0xbbc   :  { %v1333_v43 = vsel %vm308_vm12, %v1328_v38, 0  ;;  %2061 = vmatmul.msk.bf16.vlgmr.msra.gmra.mxu0 %vm308_vm12, %v1120_v2  ;;  %v2227_v23 = vunpack.i.h.bf16 %v2225_v41  ;;  %v2226_v44 = vunpack.i.l.bf16 %v2225_v41 }
 0xbbd   :  { %1501 = vmatpush.bf16.msra.mxu2 %v1492_v36  ;;  %1270 = vmatpush.bf16.xpose.msrb.mxu0 %v1261_v35 }
 0xbbe   :  { %2062 = vmatmul.msk.bf16.vlgmr.msra.gmra.mxu1 %vm308_vm12, %v1121_v37  ;;  %1342 = vmatpush.bf16.xpose.msrb.mxu3 %v1333_v43  ;;  %v1127_v39 = vpack.c.bf16 %v2227_v23, %v2227_v23  ;;  %v1126_v56 = vpack.c.bf16 %v2226_v44, %v2226_v44 }
 0xbc3   :  { %v1280_v46 = vpop.permute.xlu0 %1279  ;;  %v2230_v47 = vpop.permute.xlu1 %2229 }
 0xbc4   :  { %v1285_v40 = vsel %vm308_vm12, %v1280_v46, 0  ;;  %2067 = vmatmul.msk.bf16.vlgmr.msrb.gmra.mxu2 %vm308_vm12, %v1126_v56  ;;  %v2232_v42 = vunpack.i.h.bf16 %v2230_v47  ;;  %v2231_v49 = vunpack.i.l.bf16 %v2230_v47 }
 0xbc5   :  { %2068 = vmatmul.msk.bf16.vlgmr.msrb.gmra.mxu3 %vm308_vm12, %v1127_v39  ;;  %1294 = vmatpush.bf16.xpose.msrb.mxu1 %v1285_v40 }
 0xbc6   :  { %v1125_v51 = vpack.c.bf16 %v2232_v42, %v2232_v42  ;;  %v1124_v53 = vpack.c.bf16 %v2231_v49, %v2231_v49 }
 0xbcc   :  { %2065 = vmatmul.msk.bf16.vlgmr.msrb.gmra.mxu0 %vm308_vm12, %v1124_v53 }
 0xbce   :  { %2066 = vmatmul.msk.bf16.vlgmr.msrb.gmra.mxu1 %vm308_vm12, %v1125_v51 }
 0xc37   :  { %v1224_v54 = vpop.f32.mrf.mxu2  ;;  %v1248_v55 = vpop.f32.mrf.mxu3 }
 0xc38   :  { %v1225_v63 = vadd.f32 %v1224_v54, %v2634_v52  ;;  %v1249_v2 = vadd.f32 %v1248_v55, %v2618_v17 }
 0xc39   :  { %v1176_v57 = vpop.f32.mrf.mxu0 }
 0xc3a   :  { %v1177_v59 = vadd.f32 %v1176_v57, %v2634_v52  ;;  %v1354_v25 = vsel %vm308_vm12, %v1225_v63, -inf  ;;  %v1357_v38 = vsel %vm308_vm12, %v1249_v2, -inf }
 0xc3b   :  { %v1200_v58 = vpop.f32.mrf.mxu1 }
 0xc3c   :  { %v1201_v60 = vadd.f32 %v1200_v58, %v2618_v17  ;;  %v1348_v1 = vsel %vm308_vm12, %v1177_v59, -inf }
 0xc3d   :  { %1349 = vmax.xlane.f32.xlu1 %v1348_v1 }
 0xc3e   :  { %v1351_v0 = vsel %vm308_vm12, %v1201_v60, -inf }
 0xc3f   :  { %1352 = vmax.xlane.f32.xlu2 %v1351_v0  ;;  %v1226_v3 = vpop.f32.mrf.mxu2  ;;  %v1250_v4 = vpop.f32.mrf.mxu3 }
 0xc41   :  { %v1178_v45 = vpop.f32.mrf.mxu0 }
 0xc43   :  { %v1202_v5 = vpop.f32.mrf.mxu1 }
 0xc47   :  { %v1320_v6 = vpop.f32.mrf.mxu2 }
 0xc48   :  { %v1344_v10 = vpop.f32.mrf.mxu3  ;;  %v1321_v43 = vadd.f32 %v1320_v6, %v2634_v52 }
 0xc49   :  { %v1272_v11 = vpop.f32.mrf.mxu0 }
 0xc4a   :  { %v1273_v14 = vadd.f32 %v1272_v11, %v2634_v52  ;;  %v1366_v23 = vsel %vm308_vm12, %v1321_v43, -inf }
 0xc4b   :  { %v1296_v13 = vpop.f32.mrf.mxu1 }
 0xc4c   :  { %v1297_v16 = vadd.f32 %v1296_v13, %v2618_v17  ;;  %v1360_v19 = vsel %vm308_vm12, %v1273_v14, -inf }
 0xc4d   :  { %1361 = vmax.xlane.f32.xlu2 %v1360_v19 }
 0xc4e   :  { %v1363_v18 = vsel %vm308_vm12, %v1297_v16, -inf }
 0xc4f   :  { %1364 = vmax.xlane.f32.xlu0 %v1363_v18  ;;  %v1322_v20 = vpop.f32.mrf.mxu2 }
 0xc50   :  { %v1346_v21 = vpop.f32.mrf.mxu3 }
 0xc51   :  { %v1274_v22 = vpop.f32.mrf.mxu0 }
 0xc53   :  { %v1298_v26 = vpop.f32.mrf.mxu1 }
 0xc55   :  { %1355 = vmax.xlane.f32.xlu2 %v1354_v25 }
 0xc6d   :  { %1465 = vrot.lane.b32.xlu2 %v2817_v8, %s2373_s6 }
 0xc75   :  { %1570 = vrot.lane.b32.xlu2 %v2804_v24, %s2373_s6  ;;  %v1345_v24 = vadd.f32 %v1344_v10, %v2618_v17 }
 0xc77   :  { %v1369_v37 = vsel %vm308_vm12, %v1345_v24, -inf }
 0xcb0   :  { %v1350_v28 = vpop.xlane.xlu1 %1349 }
 0xcb1   :  { %v1372_v29 = vsub.f32 %v1177_v59, %v1350_v28 }
 0xcb2   :  { %v1353_v27 = vpop.xlane.xlu2 %1352 }
 0xcb3   :  { %v1373_v7 = vsub.f32 %v1201_v60, %v1353_v27  ;;  %v1380_v31 = vmul.f32 1.442695, %v1372_v29 }
 0xcb5   :  { %v1382_v30 = vmul.f32 1.442695, %v1373_v7 }
 0xcb7   :  { %2318 = vpow2.f32 %v1382_v30 }
 0xcb8   :  { %2320 = vpow2.f32 %v1380_v31 }
 0xcbd   :  { %v2319_v32 = vpop.eup %2318 }
 0xcbe   :  { %v2871_v33 = vpop.eup %2320  ;;  %v1399_v35 = vsel %vm308_vm12, %v2319_v32, 0.0 }
 0xcbf   :  { %1400 = vadd.xlane.f32.xlu1 %v1399_v35  ;;  %v1396_v8 = vsel %vm308_vm12, %v2871_v33, 0.0 }
 0xcc0   :  { %1397 = vadd.xlane.f32.xlu0 %v1396_v8  ;;  %v1362_v36 = vpop.xlane.xlu2 %1361 }
 0xcc1   :  { %v1376_v17 = vsub.f32 %v1273_v14, %v1362_v36 }
 0xcc2   :  { %v1365_v47 = vpop.xlane.xlu0 %1364 }
 0xcc3   :  { %v1377_v52 = vsub.f32 %v1297_v16, %v1365_v47  ;;  %v1388_v40 = vmul.f32 1.442695, %v1376_v17 }
 0xcc5   :  { %v1390_v42 = vmul.f32 1.442695, %v1377_v52  ;;  %2322 = vpow2.f32 %v1388_v40 }
 0xcc7   :  { %1370 = vmax.xlane.f32.xlu1 %v1369_v37  ;;  %2324 = vpow2.f32 %v1390_v42 }
 0xcc8   :  { %1358 = vmax.xlane.f32.xlu0 %v1357_v38  ;;  %v1356_v41 = vpop.xlane.xlu2 %1355 }
 0xcc9   :  { %v1374_v49 = vsub.f32 %v1225_v63, %v1356_v41 }
 0xccb   :  { %v1384_v51 = vmul.f32 1.442695, %v1374_v49  ;;  %v2888_v53 = vpop.eup %2322 }
 0xccc   :  { %v1408_v54 = vsel %vm308_vm12, %v2888_v53, 0.0 }
 0xccd   :  { %2326 = vpow2.f32 %v1384_v51  ;;  %v2892_v55 = vpop.eup %2324 }
 0xcd0   :  { %1367 = vmax.xlane.f32.xlu0 %v1366_v23  ;;  %v1466_v44 = vpop.permute.xlu2 %1465 }
 0xcd1   :  { %v1471_v39 = vsel %vm597_vm13, %v1466_v44, 0 }
 0xcd2   :  { %1480 = vmatpush.bf16.msra.mxu1 %v1471_v39 }
 0xcd8   :  { %v1571_v56 = vpop.permute.xlu2 %1570 }
 0xcd9   :  { %v1576_v46 = vsel %vm597_vm13, %v1571_v56, 0 }
 0xcda   :  { %1585 = vmatpush.bf16.msrb.mxu2 %v1576_v46 }
 0xce0   :  { %1444 = vrot.lane.b32.xlu1 %v2819_v9, %s2373_s6  ;;  %v2327_v9 = vpop.eup %2326 }
 0xce1   :  { %v1402_v57 = vsel %vm308_vm12, %v2327_v9, 0.0 }
 0xce4   :  { %1507 = vrot.lane.b32.xlu0 %v2810_v62, %s2373_s6  ;;  %v1411_v62 = vsel %vm308_vm12, %v2892_v55, 0.0 }
 0xd0a   :  { %1409 = vadd.xlane.f32.xlu1 %v1408_v54 }
 0xd0e   :  { %1412 = vadd.xlane.f32.xlu0 %v1411_v62 }
 0xd12   :  { %1403 = vadd.xlane.f32.xlu1 %v1402_v57 }
 0xd2b   :  { %1591 = vrot.lane.b32.xlu1 %v2826_v12, %s2373_s6 }
 0xd32   :  { %v1401_v58 = vpop.xlane.xlu1 %1400 }
 0xd33   :  { %v1398_v59 = vpop.xlane.xlu0 %1397  ;;  %2328 = vrcp.f32 %v1401_v58 }
 0xd39   :  { %v2329_v60 = vpop.eup %2328 }
 0xd3a   :  { %v1429_v0 = vmul.f32 %v2329_v60, %v2319_v32  ;;  %v1371_v3 = vpop.xlane.xlu1 %1370 }
 0xd3b   :  { %v1359_v1 = vpop.xlane.xlu0 %1358  ;;  %v1379_v6 = vsub.f32 %v1345_v24, %v1371_v3 }
 0xd3c   :  { %v1437_v4 = vpack.c.bf16 %v1429_v0, %v1429_v0  ;;  %v1375_v45 = vsub.f32 %v1249_v2, %v1359_v1 }
 0xd3d   :  { %v1394_v10 = vmul.f32 1.442695, %v1379_v6 }
 0xd3e   :  { %v1386_v5 = vmul.f32 1.442695, %v1375_v45  ;;  %2070 = vmatmul.msk.bf16.vlgmr.msra.gmra.mxu1 %vm308_vm12, %v1437_v4 }
 0xd40   :  { %2330 = vpow2.f32 %v1386_v5 }
 0xd41   :  { %2332 = vpow2.f32 %v1394_v10 }
 0xd42   :  { %2334 = vrcp.f32 %v1398_v59 }
 0xd43   :  { %v1368_v11 = vpop.xlane.xlu0 %1367 }
 0xd44   :  { %v1378_v13 = vsub.f32 %v1321_v43, %v1368_v11 }
 0xd46   :  { %v2331_v14 = vpop.eup %2330  ;;  %v1392_v12 = vmul.f32 1.442695, %v1378_v13 }
 0xd47   :  { %v1405_v16 = vsel %vm308_vm12, %v2331_v14, 0.0  ;;  %v2333_v18 = vpop.eup %2332 }
 0xd48   :  { %2336 = vpow2.f32 %v1392_v12  ;;  %1406 = vadd.xlane.f32.xlu2 %v1405_v16  ;;  %v2335_v19 = vpop.eup %2334  ;;  %v1417_v63 = vsel %vm308_vm12, %v2333_v18, 0.0  ;;  %v2157_v16 = vld [vmem:[%s3023_s9 + $0x18] sm:$0xff] }
 0xd49   :  { %v1428_v22 = vmul.f32 %v2335_v19, %v2871_v33 }
 0xd4b   :  { %v1436_v27 = vpack.c.bf16 %v1428_v22, %v1428_v22 }
 0xd4e   :  { %v2337_v20 = vpop.eup %2336 }
 0xd4f   :  { %v1414_v21 = vsel %vm308_vm12, %v2337_v20, 0.0 }
 0xd50   :  { %1415 = vadd.xlane.f32.xlu0 %v1414_v21  ;;  %1418 = vadd.xlane.f32.xlu2 %v1417_v63 }
 0xd52   :  { %v1445_v26 = vpop.permute.xlu1 %1444 }
 0xd53   :  { %v1450_v25 = vsel %vm597_vm13, %v1445_v26, 0 }
 0xd54   :  { %1459 = vmatpush.bf16.msra.mxu0 %v1450_v25 }
 0xd56   :  { %v1508_v28 = vpop.permute.xlu0 %1507 }
 0xd57   :  { %v1513_v7 = vsel %vm597_vm13, %v1508_v28, 0  ;;  %2069 = vmatmul.msk.bf16.vlgmr.msra.gmra.mxu0 %vm308_vm12, %v1436_v27 }
 0xd58   :  { %1522 = vmatpush.bf16.msra.mxu3 %v1513_v7 }
 0xd64   :  { %1528 = vrot.lane.b32.xlu0 %v2808_v61, %s2373_s6 }
 0xd68   :  { %1549 = vrot.lane.b32.xlu2 %v2831_v15, %s2373_s6 }
 0xd7d   :  { %v1410_v29 = vpop.xlane.xlu1 %1409 }
 0xd81   :  { %v1413_v24 = vpop.xlane.xlu0 %1412 }
 0xd85   :  { %v1404_v30 = vpop.xlane.xlu1 %1403 }
 0xd86   :  { %2338 = vrcp.f32 %v1404_v30 }
 0xd8c   :  { %v2339_v31 = vpop.eup %2338 }
 0xd8d   :  { %v1430_v32 = vmul.f32 %v2339_v31, %v2327_v9 }
 0xd8f   :  { %v1438_v33 = vpack.c.bf16 %v1430_v32, %v1430_v32 }
 0xd91   :  { %2071 = vmatmul.msk.bf16.vlgmr.msra.gmra.mxu2 %vm308_vm12, %v1438_v33 }
 0xd9d   :  { %v1592_v35 = vpop.permute.xlu1 %1591 }
 0xd9e   :  { %v1597_v8 = vsel %vm597_vm13, %v1592_v35, 0 }
 0xd9f   :  { %1606 = vmatpush.bf16.msrb.mxu3 %v1597_v8  ;;  %v2260_v8 = vld [vmem:[%s3022_s10 + $0x1] ss:$0 sm:$0xff] }
 0xdbb   :  { %v1407_v36 = vpop.xlane.xlu2 %1406  ;;  %v2913_v2 = vpop.f32.mrf.mxu1 }
 0xdbc   :  { %2340 = vrcp.f32 %v1407_v36 }
 0xdbd   :  { %2342 = vrcp.f32 %v1413_v24 }
 0xdc2   :  { %v2341_v61 = vpop.eup %2340 }
 0xdc3   :  { %v1431_v15 = vmul.f32 %v2341_v61, %v2331_v14  ;;  %v1416_v37 = vpop.xlane.xlu0 %1415  ;;  %v1419_v38 = vpop.xlane.xlu2 %1418 }
 0xdc4   :  { %2344 = vrcp.f32 %v1416_v37  ;;  %v1484_v41 = vpop.f32.mrf.mxu1  ;;  %v2343_v23 = vpop.eup %2342 }
 0xdc5   :  { %v1439_v43 = vpack.c.bf16 %v1431_v15, %v1431_v15  ;;  %2346 = vrcp.f32 %v1419_v38  ;;  %v1433_v39 = vmul.f32 %v2343_v23, %v2892_v55 }
 0xdc6   :  { %2348 = vrcp.f32 %v1410_v29 }
 0xdc7   :  { %2072 = vmatmul.msk.bf16.vlgmr.msra.gmra.mxu3 %vm308_vm12, %v1439_v43  ;;  %v1441_v40 = vpack.c.bf16 %v1433_v39, %v1433_v39 }
 0xdca   :  { %v2345_v44 = vpop.eup %2344 }
 0xdcb   :  { %v1434_v56 = vmul.f32 %v2345_v44, %v2337_v20  ;;  %v1550_v46 = vpop.permute.xlu2 %1549  ;;  %v2347_v52 = vpop.eup %2346 }
 0xdcc   :  { %v1555_v17 = vsel %vm597_vm13, %v1550_v46, 0  ;;  %v1435_v42 = vmul.f32 %v2347_v52, %v2333_v18  ;;  %v2349_v49 = vpop.eup %2348  ;;  %v2156_v18 = vld [vmem:[%s3023_s9 + $0x10] sm:$0xff] }
 0xdcd   :  { %v1442_v47 = vpack.c.bf16 %v1434_v56, %v1434_v56  ;;  %1564 = vmatpush.bf16.msrb.mxu1 %v1555_v17  ;;  %v1432_v54 = vmul.f32 %v2349_v49, %v2888_v53 }
 0xdce   :  { %v1443_v62 = vpack.c.bf16 %v1435_v42, %v1435_v42 }
 0xdcf   :  { %2075 = vmatmul.msk.bf16.vlgmr.msrb.gmra.mxu2 %vm308_vm12, %v1442_v47  ;;  %v1440_v57 = vpack.c.bf16 %v1432_v54, %v1432_v54 }
 0xdd0   :  { %2074 = vmatmul.msk.bf16.vlgmr.msrb.gmra.mxu1 %vm308_vm12, %v1441_v40 }
 0xdd4   :  { %v1461_v51 = vpop.f32.mrf.mxu0 }
 0xdd6   :  { %v1529_v55 = vpop.permute.xlu0 %1528 }
 0xdd7   :  { %v1534_v9 = vsel %vm597_vm13, %v1529_v55, 0  ;;  %2076 = vmatmul.msk.bf16.vlgmr.msrb.gmra.mxu3 %vm308_vm12, %v1443_v62 }
 0xdd8   :  { %1543 = vmatpush.bf16.msrb.mxu0 %v1534_v9 }
 0xddb   :  { %2073 = vmatmul.msk.bf16.vlgmr.msrb.gmra.mxu0 %vm308_vm12, %v1440_v57 }
 0xddc   :  { %v1463_v58 = vpop.f32.mrf.mxu0  ;;  %1674 = vmatpush.bf16.msra.mxu0 %v2157_v16 }
 0xde0   :  { %1675 = vmatpush.bf16.msra.mxu0 %v2156_v18 }
 0xe14   :  { %v1503_v59 = vpop.f32.mrf.mxu2 }
 0xe1c   :  { %v1505_v60 = vpop.f32.mrf.mxu2 }
 0xe4a   :  { %v1524_v0 = vpop.f32.mrf.mxu3 }
 0xe4b   :  { %v2233_v1 = vpack.i.bf16 %v1524_v0, %v1503_v59 }
 0xe4d   :  { %v1566_v3 = vpop.f32.mrf.mxu1  ;;  %2234 = vrot.lane.b32.xlu0 %v2233_v1, %s2374_s1 }
 0xe52   :  { %v1526_v4 = vpop.f32.mrf.mxu3  ;;  %v1587_v53 = vpop.f32.mrf.mxu2 }
 0xe55   :  { %v1568_v45 = vpop.f32.mrf.mxu1 }
 0xe58   :  { %v1545_v5 = vpop.f32.mrf.mxu0 }
 0xe59   :  { %v2238_v6 = vpack.i.bf16 %v1566_v3, %v1545_v5 }
 0xe5a   :  { %v1589_v10 = vpop.f32.mrf.mxu2  ;;  %v1608_v11 = vpop.f32.mrf.mxu3 }
 0xe5b   :  { %v2243_v13 = vpack.i.bf16 %v1608_v11, %v1587_v53  ;;  %2239 = vrot.lane.b32.xlu1 %v2238_v6, %s3051_s8  ;;  %v2261_v6 = vld [vmem:[%s3024_s11 + $0x1] ss:$0 sm:$0xff] }
 0xe5d   :  { %2244 = vrot.lane.b32.xlu2 %v2243_v13, %s3052_s5 }
 0xe60   :  { %v1547_v14 = vpop.f32.mrf.mxu0 }
 0xe61   :  { %v2262_v14 = vld [vmem:[%s3025_s12 + $0x1] ss:$0 sm:$0xff] }
 0xe62   :  { %v1610_v12 = vpop.f32.mrf.mxu3 }
 0xeb7   :  { %v2245_v63 = vpop.permute.xlu2 %2244 }
 0xeb8   :  { %v2247_v27 = vunpack.i.h.bf16 %v2245_v63  ;;  %v2246_v28 = vunpack.i.l.bf16 %v2245_v63  ;;  %v2163_v63 = vld [vmem:[%s3029_s15 + $0x38] sm:$0xff] }
 0xeb9   :  { %1846 = vmatpush.bf16.msra.mxu2 %v2163_v63 }
 0xebf   :  { %v2235_v19 = vpop.permute.xlu0 %2234 }
 0xec0   :  { %v2237_v20 = vunpack.i.h.bf16 %v2235_v19  ;;  %v2236_v21 = vunpack.i.l.bf16 %v2235_v19 }
 0xec2   :  { %v1637_v7 = vsel %vm308_vm12, %v2913_v2, %v2237_v20  ;;  %v1636_v29 = vsel %vm308_vm12, %v1461_v51, %v2236_v21  ;;  %v2158_v51 = vld [vmem:[%s3027_s13 + $0x10] sm:$0xff] }
 0xecd   :  { %v2240_v22 = vpop.permute.xlu1 %2239 }
 0xece   :  { %v2242_v26 = vunpack.i.h.bf16 %v2240_v22  ;;  %v2241_v25 = vunpack.i.l.bf16 %v2240_v22  ;;  %v2162_v22 = vld [vmem:[%s3029_s15 + $0x30] sm:$0xff] }
 0xecf   :  { %1847 = vmatpush.bf16.msra.mxu2 %v2162_v22 }
 0xed0   :  { %v1639_v30 = vsel %vm787_vm14, %v1637_v7, %v2242_v26  ;;  %v1638_v31 = vsel %vm787_vm14, %v1636_v29, %v2241_v25  ;;  %v2161_v26 = vld [vmem:[%s3029_s15 + $0x28] sm:$0xff]  ;;  %v2160_v25 = vld [vmem:[%s3029_s15 + $0x20] sm:$0xff] }
 0xed1   :  { %v1641_v32 = vsel %vm790_vm15, %v1639_v30, %v2247_v27  ;;  %v1640_v33 = vsel %vm790_vm15, %v1638_v31, %v2246_v28  ;;  %v2263_v27 = vld [vmem:[%s3026_s14 + $0x1] ss:$0 sm:$0xff] }
 0xed2   :  { %v1642_v35 = vpack.c.bf16 %v1641_v32, %v1640_v33 }
 0xed3   :  { %1848 = vmatpush.bf16.msra.mxu2 %v2161_v26  ;;  %v2265_v26 = vld [vmem:[%s3030_s17 + $0x1] ss:$0 sm:$0xff] }
 0xed4   :  { %2090 = vmatmul.msk.bf16.vlgmr.msra.gmra.mxu0 %vm135_vm4, %v1642_v35 }
 0xed7   :  { %1849 = vmatpush.bf16.msra.mxu2 %v2160_v25 }
 0xf51   :  { %v1677_v24 = vpop.f32.mrf.mxu0 }
 0xf52   :  { %v1678_v36 = vadd.f32 %v2260_v8, %v1677_v24 }
 0xf54   :  { %v1682_v2 = vadd.f32 %v1678_v36, %v2784_v50 }
 0xf56   :  { %v1688_v61 = vsel %vm135_vm4, %v1682_v2, 0.0 }
 0xf57   :  { %1689 = vadd.xlane.f32.xlu0 %v1688_v61 }
 0xf59   :  { %v1679_v15 = vpop.f32.mrf.mxu0 }
 0xf5a   :  { %v1680_v37 = vadd.f32 %v2260_v8, %v1679_v15 }
 0xf5c   :  { %v1683_v38 = vadd.f32 %v1680_v37, %v2786_v34  ;;  %v2159_v34 = vld [vmem:[%s3027_s13 + $0x18] sm:$0xff] }
 0xf5d   :  { %1774 = vmatpush.bf16.msra.mxu1 %v2159_v34 }
 0xf5e   :  { %v1691_v41 = vsel %vm135_vm4, %v1683_v38, 0.0 }
 0xf5f   :  { %1692 = vadd.xlane.f32.xlu1 %v1691_v41 }
 0xf61   :  { %1775 = vmatpush.bf16.msra.mxu1 %v2158_v51 }
 0xfca   :  { %v1690_v43 = vpop.xlane.xlu0 %1689 }
 0xfcb   :  { %v1694_v23 = vmul.f32 %v1690_v43, %v2540_v48 }
 0xfcd   :  { %v1696_v44 = vsub.f32 %v1682_v2, %v1694_v23 }
 0xfcf   :  { %v1698_v39 = vmul.f32 %v1696_v44, %v1696_v44 }
 0xfd1   :  { %v1700_v56 = vsel %vm135_vm4, %v1698_v39, 0.0 }
 0xfd2   :  { %v1693_v46 = vpop.xlane.xlu1 %1692  ;;  %1701 = vadd.xlane.f32.xlu2 %v1700_v56 }
 0xfd3   :  { %v1695_v50 = vmul.f32 %v1693_v46, %v2540_v48 }
 0xfd5   :  { %v1697_v17 = vsub.f32 %v1683_v38, %v1695_v50  ;;  %v2264_v50 = vld [vmem:[%s3028_s16 + $0x1] ss:$0 sm:$0xff] }
 0xfd7   :  { %v1699_v47 = vmul.f32 %v1697_v17, %v1697_v17 }
 0xfd9   :  { %v1703_v52 = vsel %vm135_vm4, %v1699_v47, 0.0 }
 0xfda   :  { %1704 = vadd.xlane.f32.xlu0 %v1703_v52 }
0x1045   :  { %v1702_v40 = vpop.xlane.xlu2 %1701 }
0x1046   :  { %v1706_v42 = vmul.f32 %v1702_v40, %v2540_v48 }
0x1048   :  { %v1708_v49 = vadd.f32 1e-12, %v1706_v42 }
0x104a   :  { %2350 = vrsqrt.f32 %v1708_v49  ;;  %vm1716_vm13 = vweird.f32 %v1708_v49 }
0x104d   :  { %v1705_v54 = vpop.xlane.xlu0 %1704 }
0x104e   :  { %v1707_v62 = vmul.f32 %v1705_v54, %v2540_v48 }
0x1050   :  { %v2351_v55 = vpop.eup %2350  ;;  %v1709_v9 = vadd.f32 1e-12, %v1707_v62 }
0x1051   :  { %v1711_v57 = vmul.f32 %v2351_v55, %v1708_v49  ;;  %vm1717_vm12 = vweird.f32 %v2351_v55 }
0x1052   :  { %2352 = vrsqrt.f32 %v1709_v9  ;;  %vm1718_vm14 = vmor %vm1716_vm13, %vm1717_vm12  ;;  %vm1726_vm2 = vweird.f32 %v1709_v9 }
0x1053   :  { %v1712_v58 = vmul.f32 %v2351_v55, %v1711_v57 }
0x1055   :  { %v1713_v59 = vmul.f32 0.5, %v1712_v58 }
0x1057   :  { %v1714_v60 = vsub.f32 1.5, %v1713_v59 }
0x1058   :  { %v2353_v0 = vpop.eup %2352 }
0x1059   :  { %v1715_v1 = vmul.f32 %v2351_v55, %v1714_v60  ;;  %v1721_v3 = vmul.f32 %v2353_v0, %v1709_v9  ;;  %vm1727_vm15 = vweird.f32 %v2353_v0 }
0x105a   :  { %vm1728_vm3 = vmor %vm1726_vm2, %vm1727_vm15 }
0x105b   :  { %v1722_v4 = vmul.f32 %v2353_v0, %v1721_v3  ;;  %v1719_v53 = vsel %vm1718_vm14, %v2351_v55, %v1715_v1 }
0x105c   :  { %v1730_v10 = vmul.f32 %v1719_v53, %v1696_v44 }
0x105d   :  { %v1723_v45 = vmul.f32 0.5, %v1722_v4 }
0x105e   :  { %v1735_v12 = vmul.f32 %v2261_v6, %v1730_v10  ;;  %v2164_v10 = vld [vmem:[%s3033_s19] sm:$0xff] }
0x105f   :  { %v1724_v5 = vsub.f32 1.5, %v1723_v45  ;;  %v2165_v45 = vld [vmem:[%s3033_s19 + $0x8] sm:$0xff] }
0x1060   :  { %v1740_v19 = vadd.f32 %v2262_v14, %v1735_v12  ;;  %1955 = vmatpush.bf16.msra.mxu3 %v2165_v45 }
0x1061   :  { %v1725_v11 = vmul.f32 %v2353_v0, %v1724_v5 }
0x1063   :  { %v1729_v13 = vsel %vm1728_vm3, %v2353_v0, %v1725_v11 }
0x1064   :  { %v1731_v16 = vmul.f32 %v1729_v13, %v1697_v17  ;;  %1956 = vmatpush.bf16.msra.mxu3 %v2164_v10 }
0x1066   :  { %v1736_v18 = vmul.f32 %v2261_v6, %v1731_v16 }
0x1068   :  { %v1741_v20 = vadd.f32 %v2262_v14, %v1736_v18 }
0x106a   :  { %v1742_v21 = vpack.c.bf16 %v1741_v20, %v1740_v19 }
0x106c   :  { %2106 = vmatmul.msk.bf16.vlgmr.msra.gmra.mxu1 %vm135_vm4, %v1742_v21 }
0x10e9   :  { %v1777_v28 = vpop.f32.mrf.mxu1 }
0x10ea   :  { %v1778_v7 = vadd.f32 %v2263_v27, %v1777_v28 }
0x10ec   :  { %v1784_v29 = vmul.f32 0.044715, %v1778_v7  ;;  %v1782_v43 = vmul.f32 0.5, %v1778_v7 }
0x10ee   :  { %v1786_v30 = vmul.f32 %v1784_v29, %v1778_v7 }
0x10f0   :  { %v1788_v31 = vmul.f32 %v1786_v30, %v1778_v7 }
0x10f1   :  { %v1779_v32 = vpop.f32.mrf.mxu1 }
0x10f2   :  { %v1790_v33 = vadd.f32 %v1788_v31, %v1778_v7  ;;  %v1780_v35 = vadd.f32 %v2263_v27, %v1779_v32  ;;  %v2266_v7 = vld [vmem:[%s3031_s18 + $0x1] ss:$0 sm:$0xff] }
0x10f4   :  { %v1785_v8 = vmul.f32 0.044715, %v1780_v35  ;;  %v1792_v24 = vmul.f32 0.7978846, %v1790_v33  ;;  %v1783_v23 = vmul.f32 0.5, %v1780_v35 }
0x10f6   :  { %v1787_v36 = vmul.f32 %v1785_v8, %v1780_v35  ;;  %2354 = vtanh.f32 %v1792_v24 }
0x10f8   :  { %v1789_v2 = vmul.f32 %v1787_v36, %v1780_v35 }
0x10fa   :  { %v1791_v61 = vadd.f32 %v1789_v2, %v1780_v35 }
0x10fc   :  { %v1793_v15 = vmul.f32 0.7978846, %v1791_v61  ;;  %v2355_v37 = vpop.eup %2354 }
0x10fd   :  { %v1796_v38 = vadd.f32 1.0, %v2355_v37 }
0x10fe   :  { %2356 = vtanh.f32 %v1793_v15 }
0x10ff   :  { %v1798_v39 = vmul.f32 %v1796_v38, %v1782_v43  ;;  %v2267_v38 = vld [vmem:[%s3032_s20] ss:$0 sm:$0xff] }
0x1104   :  { %v2357_v41 = vpop.eup %2356 }
0x1105   :  { %v1797_v44 = vadd.f32 1.0, %v2357_v41 }
0x1107   :  { %v1799_v56 = vmul.f32 %v1797_v44, %v1783_v23 }
0x1109   :  { %v1800_v46 = vpack.c.bf16 %v1799_v56, %v1798_v39 }
0x110b   :  { %2132 = vmatmul.msk.bf16.vlgmr.msra.gmra.mxu2 %vm982_vm7, %v1800_v46 }
0x118e   :  { %v1851_v17 = vpop.f32.mrf.mxu2 }
0x118f   :  { %v1852_v47 = vadd.f32 %v2264_v50, %v1851_v17 }
0x1191   :  { %v1856_v52 = vadd.f32 %v1852_v47, %v1740_v19 }
0x1193   :  { %v1862_v34 = vsel %vm135_vm4, %v1856_v52, 0.0 }
0x1194   :  { %1863 = vadd.xlane.f32.xlu2 %v1862_v34 }
0x1196   :  { %v1853_v40 = vpop.f32.mrf.mxu2 }
0x1197   :  { %v1854_v42 = vadd.f32 %v2264_v50, %v1853_v40 }
0x1199   :  { %v1857_v49 = vadd.f32 %v1854_v42, %v1741_v20 }
0x119b   :  { %v1865_v51 = vsel %vm135_vm4, %v1857_v49, 0.0 }
0x119c   :  { %1866 = vadd.xlane.f32.xlu1 %v1865_v51 }
0x1207   :  { %v1864_v54 = vpop.xlane.xlu2 %1863 }
0x1208   :  { %v1868_v62 = vmul.f32 %v1864_v54, %v2540_v48 }
0x120a   :  { %v1870_v55 = vsub.f32 %v1856_v52, %v1868_v62 }
0x120c   :  { %v1872_v9 = vmul.f32 %v1870_v55, %v1870_v55 }
0x120e   :  { %v1874_v57 = vsel %vm135_vm4, %v1872_v9, 0.0 }
0x120f   :  { %v1867_v58 = vpop.xlane.xlu1 %1866  ;;  %1875 = vadd.xlane.f32.xlu1 %v1874_v57 }
0x1210   :  { %v1869_v59 = vmul.f32 %v1867_v58, %v2540_v48 }
0x1212   :  { %v1871_v60 = vsub.f32 %v1857_v49, %v1869_v59 }
0x1214   :  { %v1873_v0 = vmul.f32 %v1871_v60, %v1871_v60 }
0x1216   :  { %v1877_v1 = vsel %vm135_vm4, %v1873_v0, 0.0 }
0x1217   :  { %1878 = vadd.xlane.f32.xlu0 %v1877_v1 }
0x1282   :  { %v1876_v3 = vpop.xlane.xlu1 %1875 }
0x1283   :  { %v1880_v4 = vmul.f32 %v1876_v3, %v2540_v48 }
0x1285   :  { %v1882_v53 = vadd.f32 1e-12, %v1880_v4 }
0x1287   :  { %2358 = vrsqrt.f32 %v1882_v53  ;;  %vm1890_vm6 = vweird.f32 %v1882_v53 }
0x128a   :  { %v1879_v5 = vpop.xlane.xlu0 %1878 }
0x128b   :  { %v1881_v6 = vmul.f32 %v1879_v5, %v2540_v48 }
0x128d   :  { %v2359_v11 = vpop.eup %2358  ;;  %v1883_v13 = vadd.f32 1e-12, %v1881_v6 }
0x128e   :  { %v1885_v14 = vmul.f32 %v2359_v11, %v1882_v53  ;;  %vm1891_vm5 = vweird.f32 %v2359_v11 }
0x128f   :  { %2360 = vrsqrt.f32 %v1883_v13  ;;  %vm1892_vm7 = vmor %vm1890_vm6, %vm1891_vm5  ;;  %vm1900_vm9 = vweird.f32 %v1883_v13 }
0x1290   :  { %v1886_v12 = vmul.f32 %v2359_v11, %v1885_v14 }
0x1292   :  { %v1887_v16 = vmul.f32 0.5, %v1886_v12 }
0x1294   :  { %v1888_v18 = vsub.f32 1.5, %v1887_v16 }
0x1295   :  { %v2361_v19 = vpop.eup %2360 }
0x1296   :  { %v1889_v20 = vmul.f32 %v2359_v11, %v1888_v18  ;;  %v1895_v21 = vmul.f32 %v2361_v19, %v1883_v13  ;;  %vm1901_vm8 = vweird.f32 %v2361_v19 }
0x1297   :  { %vm1902_vm10 = vmor %vm1900_vm9, %vm1901_vm8 }
0x1298   :  { %v1893_v63 = vsel %vm1892_vm7, %v2359_v11, %v1889_v20  ;;  %v1896_v48 = vmul.f32 %v2361_v19, %v1895_v21 }
0x1299   :  { %v1904_v25 = vmul.f32 %v1893_v63, %v1870_v55 }
0x129a   :  { %v1897_v22 = vmul.f32 0.5, %v1896_v48 }
0x129b   :  { %v1909_v29 = vmul.f32 %v2265_v26, %v1904_v25 }
0x129c   :  { %v1898_v27 = vsub.f32 1.5, %v1897_v22 }
0x129d   :  { %v1914_v32 = vadd.f32 %v2266_v7, %v1909_v29 }
0x129e   :  { %v1899_v28 = vmul.f32 %v2361_v19, %v1898_v27 }
0x129f   :  { %v1916_v8 = vpack.c.bf16 %v1914_v32, %v1914_v32 }
0x12a0   :  { %v1903_v30 = vsel %vm1902_vm10, %v2361_v19, %v1899_v28 }
0x12a1   :  { %v1905_v31 = vmul.f32 %v1903_v30, %v1871_v60  ;;  %v1928_v2 = vunpack.c.l.b16 %v1916_v8 }
0x12a3   :  { %v1910_v33 = vmul.f32 %v2265_v26, %v1905_v31 }
0x12a5   :  { %v1915_v35 = vadd.f32 %v2266_v7, %v1910_v33 }
0x12a7   :  { %v1917_v24 = vpack.c.bf16 %v1915_v35, %v1915_v35 }
0x12a9   :  { %v1929_v36 = vunpack.c.l.b16 %v1917_v24 }
0x12ab   :  { %v1930_v61 = vrot.slane %v1929_v36, 7 }
0x12ad   :  { %v1932_v15 = vsel %vm1931_vm11, %v1930_v61, %v1928_v2 }
0x12ae   :  { %v1933_v37 = vpack.c.b16 %v1932_v15, %v1932_v15 }
0x12b0   :  { %2143 = vmatmul.msk.bf16.vlgmr.msra.gmra.mxu3 %vm135_vm4, %v1933_v37 }
0x1333   :  { %v1958_v41 = vpop.f32.mrf.mxu3 }
0x1334   :  { %v1959_v43 = vadd.f32 %v2267_v38, %v1958_v41 }
0x1336   :  { %v1962_v23 = vsub.f32 0.0, %v1959_v43 }
0x1338   :  { %v1963_v44 = vmul.f32 1.442695, %v1962_v23 }
0x133a   :  { %2362 = vpow2.f32 %v1963_v44 }
0x133b   :  { %v1960_v39 = vpop.f32.mrf.mxu3 }
0x1340   :  { %v2363_v56 = vpop.eup %2362 }
0x1341   :  { %v1965_v46 = vadd.f32 1.0, %v2363_v56 }
0x1343   :  { %2364 = vrcp.f32 %v1965_v46  ;;  %v1977_v52 = vand.u32 2147483648, %v1965_v46  ;;  %v1975_v40 = vand.u32 2147483647, %v1965_v46  ;;  %vm1971_vm4 = vweird.f32 %v1965_v46 }
0x1345   :  { %v1978_v49 = vor.u32 1.1754944e-38, %v1977_v52  ;;  %vm1976_vm12 = vcmp.eq.f32.partialorder %v1975_v40, 8.507059e+37 }
0x1349   :  { %v2365_v50 = vpop.eup %2364 }
0x134a   :  { %v1967_v17 = vmul.f32 %v2365_v50, %v1965_v46  ;;  %vm1972_vm0 = vweird.f32 %v2365_v50 }
0x134b   :  { %vm1973_vm1 = vmor %vm1971_vm4, %vm1972_vm0 }
0x134c   :  { %v1968_v47 = vsub.f32 1.0, %v1967_v17 }
0x134e   :  { %v1969_v34 = vmul.f32 %v2365_v50, %v1968_v47 }
0x1350   :  { %v1970_v42 = vadd.f32 %v2365_v50, %v1969_v34 }
0x1352   :  { %v1974_v51 = vsel %vm1973_vm1, %v2365_v50, %v1970_v42 }
0x1353   :  { %v1979_v54 = vsel %vm1976_vm12, %v1978_v49, %v1974_v51 }
0x1354   :  { %1981 = vst [vmem:[%s3034_s21] sm:$0x3] %v1979_v54 }

</bundles_post_ra>
